<compile_context>
chip_gen: v7x
topology: tpu7x:2x2x1
jax: 0.10.0
libtpu: 0.0.40
codegen_flags: <defaults>
</compile_context>

<pallas_src>
import math
import functools

import jax
import jax.numpy as jnp
from jax.experimental import pallas as pl
from jax.experimental.pallas import tpu as pltpu


# ---------------------------------------------------------------------------
# In-kernel helpers (traced inside the Pallas kernel body)
# ---------------------------------------------------------------------------
def _layer_norm(x, g, b, eps=1e-6):
    mu = jnp.mean(x, axis=-1, keepdims=True)
    xc = x - mu
    var = jnp.mean(xc * xc, axis=-1, keepdims=True)
    return xc * jax.lax.rsqrt(var + eps) * g + b


def _gelu(x):
    # PreSumm / BERT tanh-approximation gelu
    return 0.5 * x * (1.0 + jnp.tanh(math.sqrt(2.0 / math.pi)
                                     * (x + 0.044715 * x * x * x)))


def _dot_nt(a, b):
    # (S, dh) x (S, dh) -> (S, S): A @ B^T on the MXU (contract last dims).
    return jax.lax.dot_general(a, b, (((1,), (1,)), ((), ())),
                               preferred_element_type=jnp.float32)


def _bf16(x):
    return x.astype(jnp.bfloat16)


# ---------------------------------------------------------------------------
# Pallas kernel: one full encoder layer for a single batch element
# ---------------------------------------------------------------------------
def _encoder_layer_kernel(heads, apply_ln1,
                          x_ref, bias_ref,
                          ln1_g_ref, ln1_b_ref,
                          wq_ref, bq_ref, wk_ref, bk_ref, wv_ref, bv_ref,
                          wo_ref, bo_ref,
                          ln2_g_ref, ln2_b_ref,
                          w1_ref, b1_ref, w2_ref, b2_ref,
                          o_ref):
    x = x_ref[0]                                   # (S, D), f32
    S, D = x.shape

    # ----- (iter != 0) ? layer_norm(inputs) : inputs  (trace-time branch) --
    x_norm = _layer_norm(x, ln1_g_ref[...], ln1_b_ref[...]) if apply_ln1 else x
    xb = _bf16(x_norm)                             # single bf16 cast, reused below

    bias = bias_ref[0]                             # (1, S) additive 0 / -1e18 bias

    # ----- multi-head self-attention ----------------------------------------
    # Head-major weight slabs: no lane slices of activations, no concat; the
    # output projection is fused as attn_out = sum_h ctx_h @ Wo_h (f32 acc).
    attn_out = jnp.zeros((S, D), jnp.float32)
    for h in range(heads):
        qh = jnp.dot(xb, wq_ref[h], preferred_element_type=jnp.float32) + bq_ref[h]
        kh = jnp.dot(xb, wk_ref[h], preferred_element_type=jnp.float32) + bk_ref[h]
        vh = jnp.dot(xb, wv_ref[h], preferred_element_type=jnp.float32) + bv_ref[h]

        s = _dot_nt(_bf16(qh), _bf16(kh)) + bias   # (S, S) scores, key mask applied
        s = s - jnp.max(s, axis=-1, keepdims=True)
        e = jnp.exp(s)
        p = e * pl.reciprocal(jnp.sum(e, axis=-1, keepdims=True), approx=True)

        ctx = jnp.dot(_bf16(p), _bf16(vh), preferred_element_type=jnp.float32)
        attn_out = attn_out + jnp.dot(_bf16(ctx), wo_ref[h],
                                      preferred_element_type=jnp.float32)

    # residual (dropout is identity in eval mode)
    out = attn_out + bo_ref[...] + x

    # ----- PositionwiseFeedForward: x + w2(gelu(w1(LN(x)))) ------------------
    out_ln = _layer_norm(out, ln2_g_ref[...], ln2_b_ref[...])
    inter = _gelu(jnp.dot(_bf16(out_ln), w1_ref[...],
                          preferred_element_type=jnp.float32) + b1_ref[...])
    ffn = jnp.dot(_bf16(inter), w2_ref[...],
                  preferred_element_type=jnp.float32) + b2_ref[...]
    o_ref[0] = (ffn + out).astype(o_ref.dtype)


# ---------------------------------------------------------------------------
# Wrapper
# ---------------------------------------------------------------------------
def transformer_encoder_layer(iter_idx, inputs, mask, params, heads):
    B, S, D = inputs.shape
    dh = D // heads
    scale = 1.0 / math.sqrt(dh)

    # Host-side weight prep (one-time, plain XLA):
    #  * fold 1/sqrt(dh) into Wq / bq
    #  * reshape Q/K/V/O weights into head-major slabs
    #  * matmul weights -> bf16 (MXU operands, half the VMEM); biases/LN stay f32
    wq_h = _bf16((params["wq"] * scale).reshape(D, heads, dh).transpose(1, 0, 2))
    wk_h = _bf16(params["wk"].reshape(D, heads, dh).transpose(1, 0, 2))
    wv_h = _bf16(params["wv"].reshape(D, heads, dh).transpose(1, 0, 2))
    wo_h = _bf16(params["wo"].reshape(heads, dh, D))
    bq_h = (params["bq"] * scale).reshape(heads, 1, dh)
    bk_h = params["bk"].reshape(heads, 1, dh)
    bv_h = params["bv"].reshape(heads, 1, dh)
    w1 = _bf16(params["w1"])
    w2 = _bf16(params["w2"])

    weights = [
        params["ln1_g"], params["ln1_b"],
        wq_h, bq_h, wk_h, bk_h, wv_h, bv_h,
        wo_h, params["bo"],
        params["ln2_g"], params["ln2_b"],
        w1, params["b1"], w2, params["b2"],
    ]

    # Additive key-padding bias (True -> -1e18), built once on the host.
    bias = jnp.where(mask.astype(bool), -1e18, 0.0).astype(jnp.float32).reshape(B, 1, S)

    in_specs = [
        pl.BlockSpec((1, S, D), lambda b: (b, 0, 0)),   # activations
        pl.BlockSpec((1, 1, S), lambda b: (b, 0, 0)),   # mask bias
    ] + [
        pl.BlockSpec(w.shape, lambda b, nd=w.ndim: (0,) * nd) for w in weights
    ]

    # VMEM budget: per-step activation blocks + resident weights, double-buffered,
    # plus headroom (clamped below physical VMEM on all generations).
    def _nbytes(a):
        return a.size * a.dtype.itemsize
    per_step = 2 * S * D * 4 + S * 4 + sum(_nbytes(w) for w in weights)
    vmem_limit = int(min(2 * per_step + (16 << 20), 96 << 20))

    kernel = functools.partial(_encoder_layer_kernel, heads, bool(iter_idx != 0))
    return pl.pallas_call(
        kernel,
        out_shape=jax.ShapeDtypeStruct((B, S, D), inputs.dtype),
        grid_spec=pltpu.PrefetchScalarGridSpec(
            num_scalar_prefetch=0,
            grid=(B,),
            in_specs=in_specs,
            out_specs=pl.BlockSpec((1, S, D), lambda b: (b, 0, 0)),
        ),
        compiler_params=pltpu.CompilerParams(
            dimension_semantics=("parallel",),
            vmem_limit_bytes=vmem_limit,
        ),
    )(inputs, bias, *weights)


# ---------------------------------------------------------------------------
# Pure-JAX f32 reference (same math as the PyTorch module) for a sanity check
# ---------------------------------------------------------------------------
def _reference(iter_idx, x, mask, p, heads):
    B, S, D = x.shape
    dh = D // heads

    def ln(v, g, b):
        mu = v.mean(-1, keepdims=True)
        var = ((v - mu) ** 2).mean(-1, keepdims=True)
        return (v - mu) / jnp.sqrt(var + 1e-6) * g + b

    xn = ln(x, p["ln1_g"], p["ln1_b"]) if iter_idx != 0 else x
    q = xn @ p["wq"] + p["bq"]
    k = xn @ p["wk"] + p["bk"]
    v = xn @ p["wv"] + p["bv"]

    def split(t):  # (B,S,D) -> (B,H,S,dh)
        return t.reshape(B, S, heads, dh).transpose(0, 2, 1, 3)

    qh, kh, vh = split(q) / math.sqrt(dh), split(k), split(v)
    scores = jnp.einsum("bhqd,bhkd->bhqk", qh, kh)
    scores = jnp.where(mask[:, None, None, :], -1e18, scores)
    attn = jax.nn.softmax(scores, axis=-1)
    ctx = jnp.einsum("bhqk,bhkd->bhqd", attn, vh)
    ctx = ctx.transpose(0, 2, 1, 3).reshape(B, S, D)
    out = ctx @ p["wo"] + p["bo"] + x

    on = ln(out, p["ln2_g"], p["ln2_b"])
    pre = on @ p["w1"] + p["b1"]
    inter = 0.5 * pre * (1.0 + jnp.tanh(math.sqrt(2.0 / math.pi)
                                        * (pre + 0.044715 * pre ** 3)))
    return inter @ p["w2"] + p["b2"] + out


# ---------------------------------------------------------------------------
if __name__ == "__main__":
    # Lane-friendly but small shapes: D multiple of 128, S = one sublane tile.
    B, S, D, HEADS, DFF = 2, 8, 128, 4, 256

    key = jax.random.PRNGKey(0)
    ks = jax.random.split(key, 16)

    def init(k, shape, scale=0.02):
        return (scale * jax.random.normal(k, shape)).astype(jnp.float32)

    params = {
        "ln1_g": jnp.ones((1, D), jnp.float32),
        "ln1_b": jnp.zeros((1, D), jnp.float32),
        "wq": init(ks[0], (D, D)), "bq": init(ks[1], (1, D)),
        "wk": init(ks[2], (D, D)), "bk": init(ks[3], (1, D)),
        "wv": init(ks[4], (D, D)), "bv": init(ks[5], (1, D)),
        "wo": init(ks[6], (D, D)), "bo": init(ks[7], (1, D)),
        "ln2_g": jnp.ones((1, D), jnp.float32),
        "ln2_b": jnp.zeros((1, D), jnp.float32),
        "w1": init(ks[8], (D, DFF)), "b1": init(ks[9], (1, DFF)),
        "w2": init(ks[10], (DFF, D)), "b2": init(ks[11], (1, D)),
    }

    x = jax.random.normal(ks[12], (B, S, D), dtype=jnp.float32)
    mask = jnp.zeros((B, S), dtype=bool).at[1, 6:].set(True)  # pad out last 2 keys of batch 1
    iter_idx = 1                                              # exercise the pre-layernorm branch

    out = transformer_encoder_layer(iter_idx, x, mask, params, HEADS)
    out = jax.block_until_ready(out)

    ref = _reference(iter_idx, x, mask, params, HEADS)
    assert out.shape == (B, S, D)
    # bf16 MXU operands (f32 accumulation) vs. the f32 reference.
    assert jnp.allclose(out, ref, rtol=5e-3, atol=5e-3), "mismatch vs reference"

    print("KERNEL_OK")
</pallas_src>

<mosaic_0001>
module attributes {stable_mosaic.version = 11 : i64} {
  func.func @_encoder_layer_kernel(%arg0: i32, %arg1: memref<1x8x128xf32, #tpu.memory_space<vmem>>, %arg2: memref<1x1x8xf32, #tpu.memory_space<vmem>>, %arg3: memref<1x128xf32, #tpu.memory_space<vmem>>, %arg4: memref<1x128xf32, #tpu.memory_space<vmem>>, %arg5: memref<4x128x32xbf16, #tpu.memory_space<vmem>>, %arg6: memref<4x1x32xf32, #tpu.memory_space<vmem>>, %arg7: memref<4x128x32xbf16, #tpu.memory_space<vmem>>, %arg8: memref<4x1x32xf32, #tpu.memory_space<vmem>>, %arg9: memref<4x128x32xbf16, #tpu.memory_space<vmem>>, %arg10: memref<4x1x32xf32, #tpu.memory_space<vmem>>, %arg11: memref<4x32x128xbf16, #tpu.memory_space<vmem>>, %arg12: memref<1x128xf32, #tpu.memory_space<vmem>>, %arg13: memref<1x128xf32, #tpu.memory_space<vmem>>, %arg14: memref<1x128xf32, #tpu.memory_space<vmem>>, %arg15: memref<128x256xbf16, #tpu.memory_space<vmem>>, %arg16: memref<1x256xf32, #tpu.memory_space<vmem>>, %arg17: memref<256x128xbf16, #tpu.memory_space<vmem>>, %arg18: memref<1x128xf32, #tpu.memory_space<vmem>>, %arg19: memref<1x8x128xf32, #tpu.memory_space<vmem>>) attributes {dimension_semantics = [#tpu.dimension_semantics<parallel>], iteration_bounds = array<i64: 2>, scalar_prefetch = 0 : i64, scratch_operands = 0 : i64, tpu.core_type = #tpu.core_type<tc>, window_params = [{transform_indices = @transform_0, window_bounds = array<i64: 1, 8, 128>}, {transform_indices = @transform_1, window_bounds = array<i64: 1, 1, 8>}, {pipeline_mode = #tpu.pipeline_mode<synchronous>, transform_indices = @transform_2, window_bounds = array<i64: 1, 128>}, {pipeline_mode = #tpu.pipeline_mode<synchronous>, transform_indices = @transform_3, window_bounds = array<i64: 1, 128>}, {pipeline_mode = #tpu.pipeline_mode<synchronous>, transform_indices = @transform_4, window_bounds = array<i64: 4, 128, 32>}, {pipeline_mode = #tpu.pipeline_mode<synchronous>, transform_indices = @transform_5, window_bounds = array<i64: 4, 1, 32>}, {pipeline_mode = #tpu.pipeline_mode<synchronous>, transform_indices = @transform_6, window_bounds = array<i64: 4, 128, 32>}, {pipeline_mode = #tpu.pipeline_mode<synchronous>, transform_indices = @transform_7, window_bounds = array<i64: 4, 1, 32>}, {pipeline_mode = #tpu.pipeline_mode<synchronous>, transform_indices = @transform_8, window_bounds = array<i64: 4, 128, 32>}, {pipeline_mode = #tpu.pipeline_mode<synchronous>, transform_indices = @transform_9, window_bounds = array<i64: 4, 1, 32>}, {pipeline_mode = #tpu.pipeline_mode<synchronous>, transform_indices = @transform_10, window_bounds = array<i64: 4, 32, 128>}, {pipeline_mode = #tpu.pipeline_mode<synchronous>, transform_indices = @transform_11, window_bounds = array<i64: 1, 128>}, {pipeline_mode = #tpu.pipeline_mode<synchronous>, transform_indices = @transform_12, window_bounds = array<i64: 1, 128>}, {pipeline_mode = #tpu.pipeline_mode<synchronous>, transform_indices = @transform_13, window_bounds = array<i64: 1, 128>}, {pipeline_mode = #tpu.pipeline_mode<synchronous>, transform_indices = @transform_14, window_bounds = array<i64: 128, 256>}, {pipeline_mode = #tpu.pipeline_mode<synchronous>, transform_indices = @transform_15, window_bounds = array<i64: 1, 256>}, {pipeline_mode = #tpu.pipeline_mode<synchronous>, transform_indices = @transform_16, window_bounds = array<i64: 256, 128>}, {pipeline_mode = #tpu.pipeline_mode<synchronous>, transform_indices = @transform_17, window_bounds = array<i64: 1, 128>}, {transform_indices = @transform_18, window_bounds = array<i64: 1, 8, 128>}]} {
    %c0 = arith.constant 0 : index
    %c0_0 = arith.constant 0 : index
    %c0_1 = arith.constant 0 : index
    %0 = vector.load %arg1[%c0, %c0_0, %c0_1] : memref<1x8x128xf32, #tpu.memory_space<vmem>>, vector<1x8x128xf32>
    %1 = vector.shape_cast %0 : vector<1x8x128xf32> to vector<8x128xf32>
    %c0_2 = arith.constant 0 : index
    %c0_3 = arith.constant 0 : index
    %2 = vector.load %arg3[%c0_2, %c0_3] : memref<1x128xf32, #tpu.memory_space<vmem>>, vector<1x128xf32>
    %c0_4 = arith.constant 0 : index
    %c0_5 = arith.constant 0 : index
    %3 = vector.load %arg4[%c0_4, %c0_5] : memref<1x128xf32, #tpu.memory_space<vmem>>, vector<1x128xf32>
    %cst = arith.constant dense<0.000000e+00> : vector<8xf32>
    %4 = vector.multi_reduction <add>, %1, %cst [1] : vector<8x128xf32> to vector<8xf32>
    %5 = vector.shape_cast %4 : vector<8xf32> to vector<8x1xf32>
    %cst_6 = arith.constant 1.280000e+02 : f32
    %6 = vector.broadcast %cst_6 : f32 to vector<8x1xf32>
    %7 = arith.divf %5, %6 : vector<8x1xf32>
    %8 = vector.broadcast %7 : vector<8x1xf32> to vector<8x128xf32>
    %9 = arith.subf %1, %8 : vector<8x128xf32>
    %10 = arith.mulf %9, %9 : vector<8x128xf32>
    %cst_7 = arith.constant dense<0.000000e+00> : vector<8xf32>
    %11 = vector.multi_reduction <add>, %10, %cst_7 [1] : vector<8x128xf32> to vector<8xf32>
    %12 = vector.shape_cast %11 : vector<8xf32> to vector<8x1xf32>
    %cst_8 = arith.constant 1.280000e+02 : f32
    %13 = vector.broadcast %cst_8 : f32 to vector<8x1xf32>
    %14 = arith.divf %12, %13 : vector<8x1xf32>
    %cst_9 = arith.constant 9.99999997E-7 : f32
    %15 = vector.broadcast %cst_9 : f32 to vector<8x1xf32>
    %16 = arith.addf %14, %15 : vector<8x1xf32>
    %17 = math.rsqrt %16 : vector<8x1xf32>
    %18 = vector.broadcast %17 : vector<8x1xf32> to vector<8x128xf32>
    %19 = arith.mulf %9, %18 : vector<8x128xf32>
    %20 = vector.broadcast %2 : vector<1x128xf32> to vector<8x128xf32>
    %21 = arith.mulf %19, %20 : vector<8x128xf32>
    %22 = vector.broadcast %3 : vector<1x128xf32> to vector<8x128xf32>
    %23 = arith.addf %21, %22 : vector<8x128xf32>
    %24 = arith.truncf %23 : vector<8x128xf32> to vector<8x128xbf16>
    %c0_10 = arith.constant 0 : index
    %c0_11 = arith.constant 0 : index
    %c0_12 = arith.constant 0 : index
    %25 = vector.load %arg2[%c0_10, %c0_11, %c0_12] : memref<1x1x8xf32, #tpu.memory_space<vmem>>, vector<1x1x8xf32>
    %26 = vector.shape_cast %25 : vector<1x1x8xf32> to vector<1x8xf32>
    %cst_13 = arith.constant 0.000000e+00 : f32
    %27 = vector.broadcast %cst_13 : f32 to vector<8x128xf32>
    %c0_14 = arith.constant 0 : index
    %c0_15 = arith.constant 0 : index
    %c0_16 = arith.constant 0 : index
    %28 = vector.load %arg5[%c0_14, %c0_15, %c0_16] : memref<4x128x32xbf16, #tpu.memory_space<vmem>>, vector<1x128x32xbf16>
    %29 = vector.shape_cast %28 : vector<1x128x32xbf16> to vector<128x32xbf16>
    %cst_17 = arith.constant dense<0.000000e+00> : vector<8x32xf32>
    %30 = tpu.matmul %24, %29, %cst_17 {dimension_numbers = #tpu.dot_dimension_numbers<[1], [0], [0], [1], [0, 0, 1, 1], [], []>} : vector<8x128xbf16>, vector<128x32xbf16>, vector<8x32xf32> -> vector<8x32xf32>
    %c0_18 = arith.constant 0 : index
    %c0_19 = arith.constant 0 : index
    %c0_20 = arith.constant 0 : index
    %31 = vector.load %arg6[%c0_18, %c0_19, %c0_20] : memref<4x1x32xf32, #tpu.memory_space<vmem>>, vector<1x1x32xf32>
    %32 = vector.shape_cast %31 : vector<1x1x32xf32> to vector<1x32xf32>
    %33 = vector.broadcast %32 : vector<1x32xf32> to vector<8x32xf32>
    %34 = arith.addf %30, %33 : vector<8x32xf32>
    %c0_21 = arith.constant 0 : index
    %c0_22 = arith.constant 0 : index
    %c0_23 = arith.constant 0 : index
    %35 = vector.load %arg7[%c0_21, %c0_22, %c0_23] : memref<4x128x32xbf16, #tpu.memory_space<vmem>>, vector<1x128x32xbf16>
    %36 = vector.shape_cast %35 : vector<1x128x32xbf16> to vector<128x32xbf16>
    %cst_24 = arith.constant dense<0.000000e+00> : vector<8x32xf32>
    %37 = tpu.matmul %24, %36, %cst_24 {dimension_numbers = #tpu.dot_dimension_numbers<[1], [0], [0], [1], [0, 0, 1, 1], [], []>} : vector<8x128xbf16>, vector<128x32xbf16>, vector<8x32xf32> -> vector<8x32xf32>
    %c0_25 = arith.constant 0 : index
    %c0_26 = arith.constant 0 : index
    %c0_27 = arith.constant 0 : index
    %38 = vector.load %arg8[%c0_25, %c0_26, %c0_27] : memref<4x1x32xf32, #tpu.memory_space<vmem>>, vector<1x1x32xf32>
    %39 = vector.shape_cast %38 : vector<1x1x32xf32> to vector<1x32xf32>
    %40 = vector.broadcast %39 : vector<1x32xf32> to vector<8x32xf32>
    %41 = arith.addf %37, %40 : vector<8x32xf32>
    %c0_28 = arith.constant 0 : index
    %c0_29 = arith.constant 0 : index
    %c0_30 = arith.constant 0 : index
    %42 = vector.load %arg9[%c0_28, %c0_29, %c0_30] : memref<4x128x32xbf16, #tpu.memory_space<vmem>>, vector<1x128x32xbf16>
    %43 = vector.shape_cast %42 : vector<1x128x32xbf16> to vector<128x32xbf16>
    %cst_31 = arith.constant dense<0.000000e+00> : vector<8x32xf32>
    %44 = tpu.matmul %24, %43, %cst_31 {dimension_numbers = #tpu.dot_dimension_numbers<[1], [0], [0], [1], [0, 0, 1, 1], [], []>} : vector<8x128xbf16>, vector<128x32xbf16>, vector<8x32xf32> -> vector<8x32xf32>
    %c0_32 = arith.constant 0 : index
    %c0_33 = arith.constant 0 : index
    %c0_34 = arith.constant 0 : index
    %45 = vector.load %arg10[%c0_32, %c0_33, %c0_34] : memref<4x1x32xf32, #tpu.memory_space<vmem>>, vector<1x1x32xf32>
    %46 = vector.shape_cast %45 : vector<1x1x32xf32> to vector<1x32xf32>
    %47 = vector.broadcast %46 : vector<1x32xf32> to vector<8x32xf32>
    %48 = arith.addf %44, %47 : vector<8x32xf32>
    %49 = arith.truncf %34 : vector<8x32xf32> to vector<8x32xbf16>
    %50 = arith.truncf %41 : vector<8x32xf32> to vector<8x32xbf16>
    %cst_35 = arith.constant dense<0.000000e+00> : vector<8x8xf32>
    %51 = tpu.matmul %49, %50, %cst_35 {dimension_numbers = #tpu.dot_dimension_numbers<[1], [1], [0], [0], [0, 0, 1, 0], [], []>} : vector<8x32xbf16>, vector<8x32xbf16>, vector<8x8xf32> -> vector<8x8xf32>
    %52 = vector.broadcast %26 : vector<1x8xf32> to vector<8x8xf32>
    %53 = arith.addf %51, %52 : vector<8x8xf32>
    %cst_36 = arith.constant dense<0xFF800000> : vector<8xf32>
    %54 = vector.multi_reduction <maximumf>, %53, %cst_36 [1] : vector<8x8xf32> to vector<8xf32>
    %55 = vector.shape_cast %54 : vector<8xf32> to vector<8x1xf32>
    %56 = vector.broadcast %55 : vector<8x1xf32> to vector<8x8xf32>
    %57 = arith.subf %53, %56 : vector<8x8xf32>
    %58 = math.exp %57 : vector<8x8xf32>
    %cst_37 = arith.constant dense<0.000000e+00> : vector<8xf32>
    %59 = vector.multi_reduction <add>, %58, %cst_37 [1] : vector<8x8xf32> to vector<8xf32>
    %60 = vector.shape_cast %59 : vector<8xf32> to vector<8x1xf32>
    %61 = tpu.reciprocal %60 {approx = true} : vector<8x1xf32> -> vector<8x1xf32>
    %62 = vector.broadcast %61 : vector<8x1xf32> to vector<8x8xf32>
    %63 = arith.mulf %58, %62 : vector<8x8xf32>
    %64 = arith.truncf %63 : vector<8x8xf32> to vector<8x8xbf16>
    %65 = arith.truncf %48 : vector<8x32xf32> to vector<8x32xbf16>
    %cst_38 = arith.constant dense<0.000000e+00> : vector<8x32xf32>
    %66 = tpu.matmul %64, %65, %cst_38 {dimension_numbers = #tpu.dot_dimension_numbers<[1], [0], [0], [1], [0, 0, 1, 1], [], []>} : vector<8x8xbf16>, vector<8x32xbf16>, vector<8x32xf32> -> vector<8x32xf32>
    %67 = arith.truncf %66 : vector<8x32xf32> to vector<8x32xbf16>
    %c0_39 = arith.constant 0 : index
    %c0_40 = arith.constant 0 : index
    %c0_41 = arith.constant 0 : index
    %68 = vector.load %arg11[%c0_39, %c0_40, %c0_41] : memref<4x32x128xbf16, #tpu.memory_space<vmem>>, vector<1x32x128xbf16>
    %69 = vector.shape_cast %68 : vector<1x32x128xbf16> to vector<32x128xbf16>
    %cst_42 = arith.constant dense<0.000000e+00> : vector<8x128xf32>
    %70 = tpu.matmul %67, %69, %cst_42 {dimension_numbers = #tpu.dot_dimension_numbers<[1], [0], [0], [1], [0, 0, 1, 1], [], []>} : vector<8x32xbf16>, vector<32x128xbf16>, vector<8x128xf32> -> vector<8x128xf32>
    %71 = arith.addf %27, %70 : vector<8x128xf32>
    %c1 = arith.constant 1 : index
    %c0_43 = arith.constant 0 : index
    %c0_44 = arith.constant 0 : index
    %72 = vector.load %arg5[%c1, %c0_43, %c0_44] : memref<4x128x32xbf16, #tpu.memory_space<vmem>>, vector<1x128x32xbf16>
    %73 = vector.shape_cast %72 : vector<1x128x32xbf16> to vector<128x32xbf16>
    %cst_45 = arith.constant dense<0.000000e+00> : vector<8x32xf32>
    %74 = tpu.matmul %24, %73, %cst_45 {dimension_numbers = #tpu.dot_dimension_numbers<[1], [0], [0], [1], [0, 0, 1, 1], [], []>} : vector<8x128xbf16>, vector<128x32xbf16>, vector<8x32xf32> -> vector<8x32xf32>
    %c1_46 = arith.constant 1 : index
    %c0_47 = arith.constant 0 : index
    %c0_48 = arith.constant 0 : index
    %75 = vector.load %arg6[%c1_46, %c0_47, %c0_48] : memref<4x1x32xf32, #tpu.memory_space<vmem>>, vector<1x1x32xf32>
    %76 = vector.shape_cast %75 : vector<1x1x32xf32> to vector<1x32xf32>
    %77 = vector.broadcast %76 : vector<1x32xf32> to vector<8x32xf32>
    %78 = arith.addf %74, %77 : vector<8x32xf32>
    %c1_49 = arith.constant 1 : index
    %c0_50 = arith.constant 0 : index
    %c0_51 = arith.constant 0 : index
    %79 = vector.load %arg7[%c1_49, %c0_50, %c0_51] : memref<4x128x32xbf16, #tpu.memory_space<vmem>>, vector<1x128x32xbf16>
    %80 = vector.shape_cast %79 : vector<1x128x32xbf16> to vector<128x32xbf16>
    %cst_52 = arith.constant dense<0.000000e+00> : vector<8x32xf32>
    %81 = tpu.matmul %24, %80, %cst_52 {dimension_numbers = #tpu.dot_dimension_numbers<[1], [0], [0], [1], [0, 0, 1, 1], [], []>} : vector<8x128xbf16>, vector<128x32xbf16>, vector<8x32xf32> -> vector<8x32xf32>
    %c1_53 = arith.constant 1 : index
    %c0_54 = arith.constant 0 : index
    %c0_55 = arith.constant 0 : index
    %82 = vector.load %arg8[%c1_53, %c0_54, %c0_55] : memref<4x1x32xf32, #tpu.memory_space<vmem>>, vector<1x1x32xf32>
    %83 = vector.shape_cast %82 : vector<1x1x32xf32> to vector<1x32xf32>
    %84 = vector.broadcast %83 : vector<1x32xf32> to vector<8x32xf32>
    %85 = arith.addf %81, %84 : vector<8x32xf32>
    %c1_56 = arith.constant 1 : index
    %c0_57 = arith.constant 0 : index
    %c0_58 = arith.constant 0 : index
    %86 = vector.load %arg9[%c1_56, %c0_57, %c0_58] : memref<4x128x32xbf16, #tpu.memory_space<vmem>>, vector<1x128x32xbf16>
    %87 = vector.shape_cast %86 : vector<1x128x32xbf16> to vector<128x32xbf16>
    %cst_59 = arith.constant dense<0.000000e+00> : vector<8x32xf32>
    %88 = tpu.matmul %24, %87, %cst_59 {dimension_numbers = #tpu.dot_dimension_numbers<[1], [0], [0], [1], [0, 0, 1, 1], [], []>} : vector<8x128xbf16>, vector<128x32xbf16>, vector<8x32xf32> -> vector<8x32xf32>
    %c1_60 = arith.constant 1 : index
    %c0_61 = arith.constant 0 : index
    %c0_62 = arith.constant 0 : index
    %89 = vector.load %arg10[%c1_60, %c0_61, %c0_62] : memref<4x1x32xf32, #tpu.memory_space<vmem>>, vector<1x1x32xf32>
    %90 = vector.shape_cast %89 : vector<1x1x32xf32> to vector<1x32xf32>
    %91 = vector.broadcast %90 : vector<1x32xf32> to vector<8x32xf32>
    %92 = arith.addf %88, %91 : vector<8x32xf32>
    %93 = arith.truncf %78 : vector<8x32xf32> to vector<8x32xbf16>
    %94 = arith.truncf %85 : vector<8x32xf32> to vector<8x32xbf16>
    %cst_63 = arith.constant dense<0.000000e+00> : vector<8x8xf32>
    %95 = tpu.matmul %93, %94, %cst_63 {dimension_numbers = #tpu.dot_dimension_numbers<[1], [1], [0], [0], [0, 0, 1, 0], [], []>} : vector<8x32xbf16>, vector<8x32xbf16>, vector<8x8xf32> -> vector<8x8xf32>
    %96 = vector.broadcast %26 : vector<1x8xf32> to vector<8x8xf32>
    %97 = arith.addf %95, %96 : vector<8x8xf32>
    %cst_64 = arith.constant dense<0xFF800000> : vector<8xf32>
    %98 = vector.multi_reduction <maximumf>, %97, %cst_64 [1] : vector<8x8xf32> to vector<8xf32>
    %99 = vector.shape_cast %98 : vector<8xf32> to vector<8x1xf32>
    %100 = vector.broadcast %99 : vector<8x1xf32> to vector<8x8xf32>
    %101 = arith.subf %97, %100 : vector<8x8xf32>
    %102 = math.exp %101 : vector<8x8xf32>
    %cst_65 = arith.constant dense<0.000000e+00> : vector<8xf32>
    %103 = vector.multi_reduction <add>, %102, %cst_65 [1] : vector<8x8xf32> to vector<8xf32>
    %104 = vector.shape_cast %103 : vector<8xf32> to vector<8x1xf32>
    %105 = tpu.reciprocal %104 {approx = true} : vector<8x1xf32> -> vector<8x1xf32>
    %106 = vector.broadcast %105 : vector<8x1xf32> to vector<8x8xf32>
    %107 = arith.mulf %102, %106 : vector<8x8xf32>
    %108 = arith.truncf %107 : vector<8x8xf32> to vector<8x8xbf16>
    %109 = arith.truncf %92 : vector<8x32xf32> to vector<8x32xbf16>
    %cst_66 = arith.constant dense<0.000000e+00> : vector<8x32xf32>
    %110 = tpu.matmul %108, %109, %cst_66 {dimension_numbers = #tpu.dot_dimension_numbers<[1], [0], [0], [1], [0, 0, 1, 1], [], []>} : vector<8x8xbf16>, vector<8x32xbf16>, vector<8x32xf32> -> vector<8x32xf32>
    %111 = arith.truncf %110 : vector<8x32xf32> to vector<8x32xbf16>
    %c1_67 = arith.constant 1 : index
    %c0_68 = arith.constant 0 : index
    %c0_69 = arith.constant 0 : index
    %112 = vector.load %arg11[%c1_67, %c0_68, %c0_69] : memref<4x32x128xbf16, #tpu.memory_space<vmem>>, vector<1x32x128xbf16>
    %113 = vector.shape_cast %112 : vector<1x32x128xbf16> to vector<32x128xbf16>
    %cst_70 = arith.constant dense<0.000000e+00> : vector<8x128xf32>
    %114 = tpu.matmul %111, %113, %cst_70 {dimension_numbers = #tpu.dot_dimension_numbers<[1], [0], [0], [1], [0, 0, 1, 1], [], []>} : vector<8x32xbf16>, vector<32x128xbf16>, vector<8x128xf32> -> vector<8x128xf32>
    %115 = arith.addf %71, %114 : vector<8x128xf32>
    %c2 = arith.constant 2 : index
    %c0_71 = arith.constant 0 : index
    %c0_72 = arith.constant 0 : index
    %116 = vector.load %arg5[%c2, %c0_71, %c0_72] : memref<4x128x32xbf16, #tpu.memory_space<vmem>>, vector<1x128x32xbf16>
    %117 = vector.shape_cast %116 : vector<1x128x32xbf16> to vector<128x32xbf16>
    %cst_73 = arith.constant dense<0.000000e+00> : vector<8x32xf32>
    %118 = tpu.matmul %24, %117, %cst_73 {dimension_numbers = #tpu.dot_dimension_numbers<[1], [0], [0], [1], [0, 0, 1, 1], [], []>} : vector<8x128xbf16>, vector<128x32xbf16>, vector<8x32xf32> -> vector<8x32xf32>
    %c2_74 = arith.constant 2 : index
    %c0_75 = arith.constant 0 : index
    %c0_76 = arith.constant 0 : index
    %119 = vector.load %arg6[%c2_74, %c0_75, %c0_76] : memref<4x1x32xf32, #tpu.memory_space<vmem>>, vector<1x1x32xf32>
    %120 = vector.shape_cast %119 : vector<1x1x32xf32> to vector<1x32xf32>
    %121 = vector.broadcast %120 : vector<1x32xf32> to vector<8x32xf32>
    %122 = arith.addf %118, %121 : vector<8x32xf32>
    %c2_77 = arith.constant 2 : index
    %c0_78 = arith.constant 0 : index
    %c0_79 = arith.constant 0 : index
    %123 = vector.load %arg7[%c2_77, %c0_78, %c0_79] : memref<4x128x32xbf16, #tpu.memory_space<vmem>>, vector<1x128x32xbf16>
    %124 = vector.shape_cast %123 : vector<1x128x32xbf16> to vector<128x32xbf16>
    %cst_80 = arith.constant dense<0.000000e+00> : vector<8x32xf32>
    %125 = tpu.matmul %24, %124, %cst_80 {dimension_numbers = #tpu.dot_dimension_numbers<[1], [0], [0], [1], [0, 0, 1, 1], [], []>} : vector<8x128xbf16>, vector<128x32xbf16>, vector<8x32xf32> -> vector<8x32xf32>
    %c2_81 = arith.constant 2 : index
    %c0_82 = arith.constant 0 : index
    %c0_83 = arith.constant 0 : index
    %126 = vector.load %arg8[%c2_81, %c0_82, %c0_83] : memref<4x1x32xf32, #tpu.memory_space<vmem>>, vector<1x1x32xf32>
    %127 = vector.shape_cast %126 : vector<1x1x32xf32> to vector<1x32xf32>
    %128 = vector.broadcast %127 : vector<1x32xf32> to vector<8x32xf32>
    %129 = arith.addf %125, %128 : vector<8x32xf32>
    %c2_84 = arith.constant 2 : index
    %c0_85 = arith.constant 0 : index
    %c0_86 = arith.constant 0 : index
    %130 = vector.load %arg9[%c2_84, %c0_85, %c0_86] : memref<4x128x32xbf16, #tpu.memory_space<vmem>>, vector<1x128x32xbf16>
    %131 = vector.shape_cast %130 : vector<1x128x32xbf16> to vector<128x32xbf16>
    %cst_87 = arith.constant dense<0.000000e+00> : vector<8x32xf32>
    %132 = tpu.matmul %24, %131, %cst_87 {dimension_numbers = #tpu.dot_dimension_numbers<[1], [0], [0], [1], [0, 0, 1, 1], [], []>} : vector<8x128xbf16>, vector<128x32xbf16>, vector<8x32xf32> -> vector<8x32xf32>
    %c2_88 = arith.constant 2 : index
    %c0_89 = arith.constant 0 : index
    %c0_90 = arith.constant 0 : index
    %133 = vector.load %arg10[%c2_88, %c0_89, %c0_90] : memref<4x1x32xf32, #tpu.memory_space<vmem>>, vector<1x1x32xf32>
    %134 = vector.shape_cast %133 : vector<1x1x32xf32> to vector<1x32xf32>
    %135 = vector.broadcast %134 : vector<1x32xf32> to vector<8x32xf32>
    %136 = arith.addf %132, %135 : vector<8x32xf32>
    %137 = arith.truncf %122 : vector<8x32xf32> to vector<8x32xbf16>
    %138 = arith.truncf %129 : vector<8x32xf32> to vector<8x32xbf16>
    %cst_91 = arith.constant dense<0.000000e+00> : vector<8x8xf32>
    %139 = tpu.matmul %137, %138, %cst_91 {dimension_numbers = #tpu.dot_dimension_numbers<[1], [1], [0], [0], [0, 0, 1, 0], [], []>} : vector<8x32xbf16>, vector<8x32xbf16>, vector<8x8xf32> -> vector<8x8xf32>
    %140 = vector.broadcast %26 : vector<1x8xf32> to vector<8x8xf32>
    %141 = arith.addf %139, %140 : vector<8x8xf32>
    %cst_92 = arith.constant dense<0xFF800000> : vector<8xf32>
    %142 = vector.multi_reduction <maximumf>, %141, %cst_92 [1] : vector<8x8xf32> to vector<8xf32>
    %143 = vector.shape_cast %142 : vector<8xf32> to vector<8x1xf32>
    %144 = vector.broadcast %143 : vector<8x1xf32> to vector<8x8xf32>
    %145 = arith.subf %141, %144 : vector<8x8xf32>
    %146 = math.exp %145 : vector<8x8xf32>
    %cst_93 = arith.constant dense<0.000000e+00> : vector<8xf32>
    %147 = vector.multi_reduction <add>, %146, %cst_93 [1] : vector<8x8xf32> to vector<8xf32>
    %148 = vector.shape_cast %147 : vector<8xf32> to vector<8x1xf32>
    %149 = tpu.reciprocal %148 {approx = true} : vector<8x1xf32> -> vector<8x1xf32>
    %150 = vector.broadcast %149 : vector<8x1xf32> to vector<8x8xf32>
    %151 = arith.mulf %146, %150 : vector<8x8xf32>
    %152 = arith.truncf %151 : vector<8x8xf32> to vector<8x8xbf16>
    %153 = arith.truncf %136 : vector<8x32xf32> to vector<8x32xbf16>
    %cst_94 = arith.constant dense<0.000000e+00> : vector<8x32xf32>
    %154 = tpu.matmul %152, %153, %cst_94 {dimension_numbers = #tpu.dot_dimension_numbers<[1], [0], [0], [1], [0, 0, 1, 1], [], []>} : vector<8x8xbf16>, vector<8x32xbf16>, vector<8x32xf32> -> vector<8x32xf32>
    %155 = arith.truncf %154 : vector<8x32xf32> to vector<8x32xbf16>
    %c2_95 = arith.constant 2 : index
    %c0_96 = arith.constant 0 : index
    %c0_97 = arith.constant 0 : index
    %156 = vector.load %arg11[%c2_95, %c0_96, %c0_97] : memref<4x32x128xbf16, #tpu.memory_space<vmem>>, vector<1x32x128xbf16>
    %157 = vector.shape_cast %156 : vector<1x32x128xbf16> to vector<32x128xbf16>
    %cst_98 = arith.constant dense<0.000000e+00> : vector<8x128xf32>
    %158 = tpu.matmul %155, %157, %cst_98 {dimension_numbers = #tpu.dot_dimension_numbers<[1], [0], [0], [1], [0, 0, 1, 1], [], []>} : vector<8x32xbf16>, vector<32x128xbf16>, vector<8x128xf32> -> vector<8x128xf32>
    %159 = arith.addf %115, %158 : vector<8x128xf32>
    %c3 = arith.constant 3 : index
    %c0_99 = arith.constant 0 : index
    %c0_100 = arith.constant 0 : index
    %160 = vector.load %arg5[%c3, %c0_99, %c0_100] : memref<4x128x32xbf16, #tpu.memory_space<vmem>>, vector<1x128x32xbf16>
    %161 = vector.shape_cast %160 : vector<1x128x32xbf16> to vector<128x32xbf16>
    %cst_101 = arith.constant dense<0.000000e+00> : vector<8x32xf32>
    %162 = tpu.matmul %24, %161, %cst_101 {dimension_numbers = #tpu.dot_dimension_numbers<[1], [0], [0], [1], [0, 0, 1, 1], [], []>} : vector<8x128xbf16>, vector<128x32xbf16>, vector<8x32xf32> -> vector<8x32xf32>
    %c3_102 = arith.constant 3 : index
    %c0_103 = arith.constant 0 : index
    %c0_104 = arith.constant 0 : index
    %163 = vector.load %arg6[%c3_102, %c0_103, %c0_104] : memref<4x1x32xf32, #tpu.memory_space<vmem>>, vector<1x1x32xf32>
    %164 = vector.shape_cast %163 : vector<1x1x32xf32> to vector<1x32xf32>
    %165 = vector.broadcast %164 : vector<1x32xf32> to vector<8x32xf32>
    %166 = arith.addf %162, %165 : vector<8x32xf32>
    %c3_105 = arith.constant 3 : index
    %c0_106 = arith.constant 0 : index
    %c0_107 = arith.constant 0 : index
    %167 = vector.load %arg7[%c3_105, %c0_106, %c0_107] : memref<4x128x32xbf16, #tpu.memory_space<vmem>>, vector<1x128x32xbf16>
    %168 = vector.shape_cast %167 : vector<1x128x32xbf16> to vector<128x32xbf16>
    %cst_108 = arith.constant dense<0.000000e+00> : vector<8x32xf32>
    %169 = tpu.matmul %24, %168, %cst_108 {dimension_numbers = #tpu.dot_dimension_numbers<[1], [0], [0], [1], [0, 0, 1, 1], [], []>} : vector<8x128xbf16>, vector<128x32xbf16>, vector<8x32xf32> -> vector<8x32xf32>
    %c3_109 = arith.constant 3 : index
    %c0_110 = arith.constant 0 : index
    %c0_111 = arith.constant 0 : index
    %170 = vector.load %arg8[%c3_109, %c0_110, %c0_111] : memref<4x1x32xf32, #tpu.memory_space<vmem>>, vector<1x1x32xf32>
    %171 = vector.shape_cast %170 : vector<1x1x32xf32> to vector<1x32xf32>
    %172 = vector.broadcast %171 : vector<1x32xf32> to vector<8x32xf32>
    %173 = arith.addf %169, %172 : vector<8x32xf32>
    %c3_112 = arith.constant 3 : index
    %c0_113 = arith.constant 0 : index
    %c0_114 = arith.constant 0 : index
    %174 = vector.load %arg9[%c3_112, %c0_113, %c0_114] : memref<4x128x32xbf16, #tpu.memory_space<vmem>>, vector<1x128x32xbf16>
    %175 = vector.shape_cast %174 : vector<1x128x32xbf16> to vector<128x32xbf16>
    %cst_115 = arith.constant dense<0.000000e+00> : vector<8x32xf32>
    %176 = tpu.matmul %24, %175, %cst_115 {dimension_numbers = #tpu.dot_dimension_numbers<[1], [0], [0], [1], [0, 0, 1, 1], [], []>} : vector<8x128xbf16>, vector<128x32xbf16>, vector<8x32xf32> -> vector<8x32xf32>
    %c3_116 = arith.constant 3 : index
    %c0_117 = arith.constant 0 : index
    %c0_118 = arith.constant 0 : index
    %177 = vector.load %arg10[%c3_116, %c0_117, %c0_118] : memref<4x1x32xf32, #tpu.memory_space<vmem>>, vector<1x1x32xf32>
    %178 = vector.shape_cast %177 : vector<1x1x32xf32> to vector<1x32xf32>
    %179 = vector.broadcast %178 : vector<1x32xf32> to vector<8x32xf32>
    %180 = arith.addf %176, %179 : vector<8x32xf32>
    %181 = arith.truncf %166 : vector<8x32xf32> to vector<8x32xbf16>
    %182 = arith.truncf %173 : vector<8x32xf32> to vector<8x32xbf16>
    %cst_119 = arith.constant dense<0.000000e+00> : vector<8x8xf32>
    %183 = tpu.matmul %181, %182, %cst_119 {dimension_numbers = #tpu.dot_dimension_numbers<[1], [1], [0], [0], [0, 0, 1, 0], [], []>} : vector<8x32xbf16>, vector<8x32xbf16>, vector<8x8xf32> -> vector<8x8xf32>
    %184 = vector.broadcast %26 : vector<1x8xf32> to vector<8x8xf32>
    %185 = arith.addf %183, %184 : vector<8x8xf32>
    %cst_120 = arith.constant dense<0xFF800000> : vector<8xf32>
    %186 = vector.multi_reduction <maximumf>, %185, %cst_120 [1] : vector<8x8xf32> to vector<8xf32>
    %187 = vector.shape_cast %186 : vector<8xf32> to vector<8x1xf32>
    %188 = vector.broadcast %187 : vector<8x1xf32> to vector<8x8xf32>
    %189 = arith.subf %185, %188 : vector<8x8xf32>
    %190 = math.exp %189 : vector<8x8xf32>
    %cst_121 = arith.constant dense<0.000000e+00> : vector<8xf32>
    %191 = vector.multi_reduction <add>, %190, %cst_121 [1] : vector<8x8xf32> to vector<8xf32>
    %192 = vector.shape_cast %191 : vector<8xf32> to vector<8x1xf32>
    %193 = tpu.reciprocal %192 {approx = true} : vector<8x1xf32> -> vector<8x1xf32>
    %194 = vector.broadcast %193 : vector<8x1xf32> to vector<8x8xf32>
    %195 = arith.mulf %190, %194 : vector<8x8xf32>
    %196 = arith.truncf %195 : vector<8x8xf32> to vector<8x8xbf16>
    %197 = arith.truncf %180 : vector<8x32xf32> to vector<8x32xbf16>
    %cst_122 = arith.constant dense<0.000000e+00> : vector<8x32xf32>
    %198 = tpu.matmul %196, %197, %cst_122 {dimension_numbers = #tpu.dot_dimension_numbers<[1], [0], [0], [1], [0, 0, 1, 1], [], []>} : vector<8x8xbf16>, vector<8x32xbf16>, vector<8x32xf32> -> vector<8x32xf32>
    %199 = arith.truncf %198 : vector<8x32xf32> to vector<8x32xbf16>
    %c3_123 = arith.constant 3 : index
    %c0_124 = arith.constant 0 : index
    %c0_125 = arith.constant 0 : index
    %200 = vector.load %arg11[%c3_123, %c0_124, %c0_125] : memref<4x32x128xbf16, #tpu.memory_space<vmem>>, vector<1x32x128xbf16>
    %201 = vector.shape_cast %200 : vector<1x32x128xbf16> to vector<32x128xbf16>
    %cst_126 = arith.constant dense<0.000000e+00> : vector<8x128xf32>
    %202 = tpu.matmul %199, %201, %cst_126 {dimension_numbers = #tpu.dot_dimension_numbers<[1], [0], [0], [1], [0, 0, 1, 1], [], []>} : vector<8x32xbf16>, vector<32x128xbf16>, vector<8x128xf32> -> vector<8x128xf32>
    %203 = arith.addf %159, %202 : vector<8x128xf32>
    %c0_127 = arith.constant 0 : index
    %c0_128 = arith.constant 0 : index
    %204 = vector.load %arg12[%c0_127, %c0_128] : memref<1x128xf32, #tpu.memory_space<vmem>>, vector<1x128xf32>
    %205 = vector.broadcast %204 : vector<1x128xf32> to vector<8x128xf32>
    %206 = arith.addf %203, %205 : vector<8x128xf32>
    %207 = arith.addf %206, %1 : vector<8x128xf32>
    %c0_129 = arith.constant 0 : index
    %c0_130 = arith.constant 0 : index
    %208 = vector.load %arg13[%c0_129, %c0_130] : memref<1x128xf32, #tpu.memory_space<vmem>>, vector<1x128xf32>
    %c0_131 = arith.constant 0 : index
    %c0_132 = arith.constant 0 : index
    %209 = vector.load %arg14[%c0_131, %c0_132] : memref<1x128xf32, #tpu.memory_space<vmem>>, vector<1x128xf32>
    %cst_133 = arith.constant dense<0.000000e+00> : vector<8xf32>
    %210 = vector.multi_reduction <add>, %207, %cst_133 [1] : vector<8x128xf32> to vector<8xf32>
    %211 = vector.shape_cast %210 : vector<8xf32> to vector<8x1xf32>
    %cst_134 = arith.constant 1.280000e+02 : f32
    %212 = vector.broadcast %cst_134 : f32 to vector<8x1xf32>
    %213 = arith.divf %211, %212 : vector<8x1xf32>
    %214 = vector.broadcast %213 : vector<8x1xf32> to vector<8x128xf32>
    %215 = arith.subf %207, %214 : vector<8x128xf32>
    %216 = arith.mulf %215, %215 : vector<8x128xf32>
    %cst_135 = arith.constant dense<0.000000e+00> : vector<8xf32>
    %217 = vector.multi_reduction <add>, %216, %cst_135 [1] : vector<8x128xf32> to vector<8xf32>
    %218 = vector.shape_cast %217 : vector<8xf32> to vector<8x1xf32>
    %cst_136 = arith.constant 1.280000e+02 : f32
    %219 = vector.broadcast %cst_136 : f32 to vector<8x1xf32>
    %220 = arith.divf %218, %219 : vector<8x1xf32>
    %cst_137 = arith.constant 9.99999997E-7 : f32
    %221 = vector.broadcast %cst_137 : f32 to vector<8x1xf32>
    %222 = arith.addf %220, %221 : vector<8x1xf32>
    %223 = math.rsqrt %222 : vector<8x1xf32>
    %224 = vector.broadcast %223 : vector<8x1xf32> to vector<8x128xf32>
    %225 = arith.mulf %215, %224 : vector<8x128xf32>
    %226 = vector.broadcast %208 : vector<1x128xf32> to vector<8x128xf32>
    %227 = arith.mulf %225, %226 : vector<8x128xf32>
    %228 = vector.broadcast %209 : vector<1x128xf32> to vector<8x128xf32>
    %229 = arith.addf %227, %228 : vector<8x128xf32>
    %230 = arith.truncf %229 : vector<8x128xf32> to vector<8x128xbf16>
    %c0_138 = arith.constant 0 : index
    %c0_139 = arith.constant 0 : index
    %231 = vector.load %arg15[%c0_138, %c0_139] : memref<128x256xbf16, #tpu.memory_space<vmem>>, vector<128x256xbf16>
    %cst_140 = arith.constant dense<0.000000e+00> : vector<8x256xf32>
    %232 = tpu.matmul %230, %231, %cst_140 {dimension_numbers = #tpu.dot_dimension_numbers<[1], [0], [0], [1], [0, 0, 1, 1], [], []>} : vector<8x128xbf16>, vector<128x256xbf16>, vector<8x256xf32> -> vector<8x256xf32>
    %c0_141 = arith.constant 0 : index
    %c0_142 = arith.constant 0 : index
    %233 = vector.load %arg16[%c0_141, %c0_142] : memref<1x256xf32, #tpu.memory_space<vmem>>, vector<1x256xf32>
    %234 = vector.broadcast %233 : vector<1x256xf32> to vector<8x256xf32>
    %235 = arith.addf %232, %234 : vector<8x256xf32>
    %cst_143 = arith.constant 5.000000e-01 : f32
    %236 = vector.broadcast %cst_143 : f32 to vector<8x256xf32>
    %237 = arith.mulf %236, %235 : vector<8x256xf32>
    %cst_144 = arith.constant 4.471500e-02 : f32
    %238 = vector.broadcast %cst_144 : f32 to vector<8x256xf32>
    %239 = arith.mulf %238, %235 : vector<8x256xf32>
    %240 = arith.mulf %239, %235 : vector<8x256xf32>
    %241 = arith.mulf %240, %235 : vector<8x256xf32>
    %242 = arith.addf %235, %241 : vector<8x256xf32>
    %cst_145 = arith.constant 0.797884583 : f32
    %243 = vector.broadcast %cst_145 : f32 to vector<8x256xf32>
    %244 = arith.mulf %243, %242 : vector<8x256xf32>
    %245 = math.tanh %244 : vector<8x256xf32>
    %cst_146 = arith.constant 1.000000e+00 : f32
    %246 = vector.broadcast %cst_146 : f32 to vector<8x256xf32>
    %247 = arith.addf %246, %245 : vector<8x256xf32>
    %248 = arith.mulf %237, %247 : vector<8x256xf32>
    %249 = arith.truncf %248 : vector<8x256xf32> to vector<8x256xbf16>
    %c0_147 = arith.constant 0 : index
    %c0_148 = arith.constant 0 : index
    %250 = vector.load %arg17[%c0_147, %c0_148] : memref<256x128xbf16, #tpu.memory_space<vmem>>, vector<256x128xbf16>
    %cst_149 = arith.constant dense<0.000000e+00> : vector<8x128xf32>
    %251 = tpu.matmul %249, %250, %cst_149 {dimension_numbers = #tpu.dot_dimension_numbers<[1], [0], [0], [1], [0, 0, 1, 1], [], []>} : vector<8x256xbf16>, vector<256x128xbf16>, vector<8x128xf32> -> vector<8x128xf32>
    %c0_150 = arith.constant 0 : index
    %c0_151 = arith.constant 0 : index
    %252 = vector.load %arg18[%c0_150, %c0_151] : memref<1x128xf32, #tpu.memory_space<vmem>>, vector<1x128xf32>
    %253 = vector.broadcast %252 : vector<1x128xf32> to vector<8x128xf32>
    %254 = arith.addf %251, %253 : vector<8x128xf32>
    %255 = arith.addf %254, %207 : vector<8x128xf32>
    %c0_152 = arith.constant 0 : index
    %c0_153 = arith.constant 0 : index
    %c0_154 = arith.constant 0 : index
    %256 = vector.load %arg19[%c0_152, %c0_153, %c0_154] : memref<1x8x128xf32, #tpu.memory_space<vmem>>, vector<1x8x128xf32>
    %257 = vector.shape_cast %256 : vector<1x8x128xf32> to vector<8x128xf32>
    %258 = vector.shape_cast %255 : vector<8x128xf32> to vector<1x8x128xf32>
    tpu.vector_store %arg19[%c0_152, %c0_153, %c0_154], %258 {strides = array<i32>} : memref<1x8x128xf32, #tpu.memory_space<vmem>>, vector<1x8x128xf32>,
    return
  }
  func.func @transform_0(%arg0: i32) -> (i32, i32, i32) {
    %c0_i32 = arith.constant 0 : i32
    %c0_i32_0 = arith.constant 0 : i32
    %c0_i32_1 = arith.constant 0 : i32
    return %arg0, %c0_i32, %c0_i32_0 : i32, i32, i32
  }
  func.func @transform_1(%arg0: i32) -> (i32, i32, i32) {
    %c0_i32 = arith.constant 0 : i32
    %c0_i32_0 = arith.constant 0 : i32
    %c0_i32_1 = arith.constant 0 : i32
    return %arg0, %c0_i32, %c0_i32_0 : i32, i32, i32
  }
  func.func @transform_2(%arg0: i32) -> (i32, i32) {
    %c0_i32 = arith.constant 0 : i32
    %c0_i32_0 = arith.constant 0 : i32
    %c0_i32_1 = arith.constant 0 : i32
    return %c0_i32, %c0_i32_0 : i32, i32
  }
  func.func @transform_3(%arg0: i32) -> (i32, i32) {
    %c0_i32 = arith.constant 0 : i32
    %c0_i32_0 = arith.constant 0 : i32
    %c0_i32_1 = arith.constant 0 : i32
    return %c0_i32, %c0_i32_0 : i32, i32
  }
  func.func @transform_4(%arg0: i32) -> (i32, i32, i32) {
    %c0_i32 = arith.constant 0 : i32
    %c0_i32_0 = arith.constant 0 : i32
    %c0_i32_1 = arith.constant 0 : i32
    %c0_i32_2 = arith.constant 0 : i32
    return %c0_i32, %c0_i32_0, %c0_i32_1 : i32, i32, i32
  }
  func.func @transform_5(%arg0: i32) -> (i32, i32, i32) {
    %c0_i32 = arith.constant 0 : i32
    %c0_i32_0 = arith.constant 0 : i32
    %c0_i32_1 = arith.constant 0 : i32
    %c0_i32_2 = arith.constant 0 : i32
    return %c0_i32, %c0_i32_0, %c0_i32_1 : i32, i32, i32
  }
  func.func @transform_6(%arg0: i32) -> (i32, i32, i32) {
    %c0_i32 = arith.constant 0 : i32
    %c0_i32_0 = arith.constant 0 : i32
    %c0_i32_1 = arith.constant 0 : i32
    %c0_i32_2 = arith.constant 0 : i32
    return %c0_i32, %c0_i32_0, %c0_i32_1 : i32, i32, i32
  }
  func.func @transform_7(%arg0: i32) -> (i32, i32, i32) {
    %c0_i32 = arith.constant 0 : i32
    %c0_i32_0 = arith.constant 0 : i32
    %c0_i32_1 = arith.constant 0 : i32
    %c0_i32_2 = arith.constant 0 : i32
    return %c0_i32, %c0_i32_0, %c0_i32_1 : i32, i32, i32
  }
  func.func @transform_8(%arg0: i32) -> (i32, i32, i32) {
    %c0_i32 = arith.constant 0 : i32
    %c0_i32_0 = arith.constant 0 : i32
    %c0_i32_1 = arith.constant 0 : i32
    %c0_i32_2 = arith.constant 0 : i32
    return %c0_i32, %c0_i32_0, %c0_i32_1 : i32, i32, i32
  }
  func.func @transform_9(%arg0: i32) -> (i32, i32, i32) {
    %c0_i32 = arith.constant 0 : i32
    %c0_i32_0 = arith.constant 0 : i32
    %c0_i32_1 = arith.constant 0 : i32
    %c0_i32_2 = arith.constant 0 : i32
    return %c0_i32, %c0_i32_0, %c0_i32_1 : i32, i32, i32
  }
  func.func @transform_10(%arg0: i32) -> (i32, i32, i32) {
    %c0_i32 = arith.constant 0 : i32
    %c0_i32_0 = arith.constant 0 : i32
    %c0_i32_1 = arith.constant 0 : i32
    %c0_i32_2 = arith.constant 0 : i32
    return %c0_i32, %c0_i32_0, %c0_i32_1 : i32, i32, i32
  }
  func.func @transform_11(%arg0: i32) -> (i32, i32) {
    %c0_i32 = arith.constant 0 : i32
    %c0_i32_0 = arith.constant 0 : i32
    %c0_i32_1 = arith.constant 0 : i32
    return %c0_i32, %c0_i32_0 : i32, i32
  }
  func.func @transform_12(%arg0: i32) -> (i32, i32) {
    %c0_i32 = arith.constant 0 : i32
    %c0_i32_0 = arith.constant 0 : i32
    %c0_i32_1 = arith.constant 0 : i32
    return %c0_i32, %c0_i32_0 : i32, i32
  }
  func.func @transform_13(%arg0: i32) -> (i32, i32) {
    %c0_i32 = arith.constant 0 : i32
    %c0_i32_0 = arith.constant 0 : i32
    %c0_i32_1 = arith.constant 0 : i32
    return %c0_i32, %c0_i32_0 : i32, i32
  }
  func.func @transform_14(%arg0: i32) -> (i32, i32) {
    %c0_i32 = arith.constant 0 : i32
    %c0_i32_0 = arith.constant 0 : i32
    %c0_i32_1 = arith.constant 0 : i32
    return %c0_i32, %c0_i32_0 : i32, i32
  }
  func.func @transform_15(%arg0: i32) -> (i32, i32) {
    %c0_i32 = arith.constant 0 : i32
    %c0_i32_0 = arith.constant 0 : i32
    %c0_i32_1 = arith.constant 0 : i32
    return %c0_i32, %c0_i32_0 : i32, i32
  }
  func.func @transform_16(%arg0: i32) -> (i32, i32) {
    %c0_i32 = arith.constant 0 : i32
    %c0_i32_0 = arith.constant 0 : i32
    %c0_i32_1 = arith.constant 0 : i32
    return %c0_i32, %c0_i32_0 : i32, i32
  }
  func.func @transform_17(%arg0: i32) -> (i32, i32) {
    %c0_i32 = arith.constant 0 : i32
    %c0_i32_0 = arith.constant 0 : i32
    %c0_i32_1 = arith.constant 0 : i32
    return %c0_i32, %c0_i32_0 : i32, i32
  }
  func.func @transform_18(%arg0: i32) -> (i32, i32, i32) {
    %c0_i32 = arith.constant 0 : i32
    %c0_i32_0 = arith.constant 0 : i32
    %c0_i32_1 = arith.constant 0 : i32
    return %arg0, %c0_i32, %c0_i32_0 : i32, i32, i32
  }
}

</mosaic_0001>

<bundles_post_ra>
// kernel: tpu_custom_call.1
= control target key start
LH: loop header
LB: loop body
LE: loop exit
PB: predicated region body
PF: predicated region fallthrough
CT: control target
= control target key end

     0   :  { %s5103_s0 = inlined_call_operand.vmem [shape: f32[2,8,128], index: 0, kind: input, shape index: {}]   ;;  %s5104_s1 = inlined_call_operand.vmem [shape: f32[2,1,8], index: 1, kind: input, shape index: {}]   ;;  %s5105_s2 = inlined_call_operand.vmem [shape: f32[1,128], index: 2, kind: input, shape index: {}]   ;;  %s5106_s3 = inlined_call_operand.vmem [shape: f32[1,128], index: 3, kind: input, shape index: {}]   ;;  %s5107_s4 = inlined_call_operand.vmem [shape: bf16[4,128,32], index: 4, kind: input, shape index: {}]   ;;  %s5108_s5 = inlined_call_operand.vmem [shape: f32[4,1,32], index: 5, kind: input, shape index: {}]   ;;  %s5109_s6 = inlined_call_operand.vmem [shape: bf16[4,128,32], index: 6, kind: input, shape index: {}]   ;;  %s5110_s7 = inlined_call_operand.vmem [shape: f32[4,1,32], index: 7, kind: input, shape index: {}]   ;;  %s5111_s8 = inlined_call_operand.vmem [shape: bf16[4,128,32], index: 8, kind: input, shape index: {}]   ;;  %s5112_s9 = inlined_call_operand.vmem [shape: f32[4,1,32], index: 9, kind: input, shape index: {}]   ;;  %s5113_s10 = inlined_call_operand.vmem [shape: bf16[4,32,128], index: 10, kind: input, shape index: {}]   ;;  %s5114_s11 = inlined_call_operand.vmem [shape: f32[1,128], index: 11, kind: input, shape index: {}]   ;;  %s5115_s12 = inlined_call_operand.vmem [shape: f32[1,128], index: 12, kind: input, shape index: {}]   ;;  %s5116_s13 = inlined_call_operand.vmem [shape: f32[1,128], index: 13, kind: input, shape index: {}]   ;;  %s5117_s14 = inlined_call_operand.vmem [shape: bf16[128,256], index: 14, kind: input, shape index: {}]   ;;  %s5118_s15 = inlined_call_operand.vmem [shape: f32[1,256], index: 15, kind: input, shape index: {}]   ;;  %s5119_s16 = inlined_call_operand.vmem [shape: bf16[256,128], index: 16, kind: input, shape index: {}]   ;;  %s5120_s17 = inlined_call_operand.vmem [shape: f32[1,128], index: 17, kind: input, shape index: {}]   ;;  %s5121_s18 = inlined_call_operand.hbm [shape: f32[2,8,128], index: 18, kind: output, shape index: {}]  }
   0x1   :  { %5127 = sst [smem:[#allocation10_spill]] %s5103_s0 }
   0x2   :  { %5128 = sst [smem:[#allocation11_spill]] %s5104_s1 }
   0x3   :  { %5129 = sst [smem:[#allocation12_spill]] %s5105_s2 }
   0x4   :  { %23 = vsyncpa [#allocation3], 0 }
   0x5   :  { %25 = vsyncpa [#allocation3 + $0x1], 0  ;;  %s4308_s27 = smov 0   ;;  %s4310_s28 = smov 0  }
   0x6   :  { %s4312_s29 = smov 0   ;;  %s4314_s30 = smov 0  }
   0x7 LB: > { %5130 = sst [smem:[#allocation5_spill]] %s4195_s27  ;;  %s4329_s0 = sadd.s32 4294967295, %s4207_s30   ;;  %s4207_s30 = sphi %s4314_s30, %s5142_s30   ;;  %s4203_s29 = sphi %s4312_s29, %s5144_s29   ;;  %s4199_s28 = sphi %s4310_s28, %s5146_s28   ;;  %s4195_s27 = sphi %s4308_s27, %s5145_s27  }
   0x8   : > { %5131 = sst [smem:[#allocation6_spill]] %s4203_s29  ;;  %s3114_s19 = sadd.s32 4294967294, %s4207_s30  }
   0x9   : > { %s4333_s1 = sadd.s32 1, %s4207_s30   ;;  %s426_s20 = sadd.s32 1, %s4203_s29 }
   0xa   : > { %5132 = sst [smem:[#allocation7_spill]] %s4333_s1  ;;  %s423_s21 = ssub.s32 %s4207_s30, %s4333_s1 }
   0xb   : > { %p436_p0 = scmp.ne.s32.totalorder %s4203_s29, %s4199_s28  ;;  %p424_p1 = scmp.eq.s32.totalorder %s423_s21, 0 }
   0xc   : > { %p437_p2 = scmp.eq.s32.totalorder %s4329_s0, 1  ;;  %p442_p3 = scmp.ne.s32.totalorder %s4199_s28, %s4195_s27 }
   0xd   : > { %p443_p4 = scmp.eq.s32.totalorder %s3114_s19, 1  ;;  %p3117_p7 = scmp.ge.s32.totalorder %s4207_s30, 1 }
   0xe   : > { %s4344_s22 = scalar_select %p424_p1, %s4203_s29, %s426_s20  }
   0xf   : > { %p4346_p5 = por %p437_p2, %p436_p0  ;;  %p4350_p6 = por %p443_p4, %p442_p3 }
  0x10   : > { %5133 = sst [smem:[#allocation8_spill]] %s4344_s22  ;;  %p522_p8 = scmp.lt.s32.totalorder %s4207_s30, 3 }
  0x11   : > { %s5135_s23 = scalar_select %p4350_p6, 1, 0 }
  0x12   : > { %p523_p9 = pnand %p3117_p7, %p522_p8 }
  0x13   : > { %5136 = sst [smem:[#allocation9_spill]] %s5135_s23  ;;  %p578_p10 = scmp.lt.s32.totalorder (!%p523_p9), %s4329_s0, 1  ;;  %v3976_v1 = vld [vmem:[%s5107_s4] sm:$0xff] (!%p523_p9)   ;;  %v4209_v3 = vmov (!%p523_p9), 0.0   ;;  %v3978_v4 = vld [vmem:[%s5107_s4 + $0x8] sm:$0xff] (!%p523_p9)   ;;  %v3980_v6 = vld [vmem:[%s5107_s4 + $0x10] sm:$0xff] (!%p523_p9)  }
  0x14   : > { %526 = sbr.rel (%p523_p9) target bundleno = 5082 (0x13da), region = 92  ;;  %s5137_s20 = sld [smem:[#allocation10_spill]] (!%p523_p9)  ;;  %v3977_v2 = vld [vmem:[%s5109_s6] sm:$0xff] (!%p523_p9)   ;;  %3614 = vmatprep.subr.bf16.mxu0 (!%p523_p9), %v4209_v3  ;;  %3634 = vmatprep.subr.bf16.mxu1 (!%p523_p9), %v4209_v3  ;;  %v3979_v5 = vld [vmem:[%s5109_s6 + $0x8] sm:$0xff] (!%p523_p9)   ;;  %v3981_v11 = vld [vmem:[%s5109_s6 + $0x10] sm:$0xff] (!%p523_p9)   ;;  %vm4210_vm0 = vmmov (!%p523_p9), 0  }
  0x15   : > { %3615 = vmatpush3.bf16.msra.mxu0 (!%p523_p9), %v3976_v1  ;;  %3635 = vmatpush3.bf16.msra.mxu1 (!%p523_p9), %v3977_v2  ;;  %v3982_v12 = vld [vmem:[%s5107_s4 + $0x18] sm:$0xff] (!%p523_p9)   ;;  %v3984_v14 = vld [vmem:[%s5107_s4 + $0x20] sm:$0xff] (!%p523_p9)   ;;  %v3986_v16 = vld [vmem:[%s5107_s4 + $0x28] sm:$0xff] (!%p523_p9)   ;;  %s5138_s19 = sld [smem:[#allocation12_spill]] (!%p523_p9)  ;;  %vm958_vm1 = vcmask (!%p523_p9), 261120   ;;  %vm1022_vm2 = vcmask (!%p523_p9), 1043456  }
  0x16   : > { %3616 = vmatprep.subr.bf16.mxu0 (!%p523_p9), %v4209_v3  ;;  %3636 = vmatprep.subr.bf16.mxu1 (!%p523_p9), %v4209_v3  ;;  %v3983_v13 = vld [vmem:[%s5109_s6 + $0x18] sm:$0xff] (!%p523_p9)   ;;  %v3985_v15 = vld [vmem:[%s5109_s6 + $0x20] sm:$0xff] (!%p523_p9)   ;;  %v3987_v17 = vld [vmem:[%s5109_s6 + $0x28] sm:$0xff] (!%p523_p9)   ;;  %vm1005_vm3 = vcmask (!%p523_p9), 64512   ;;  %s575_s26 = sand.u32 (!%p523_p9), 1, %s4199_s28  }
  0x17   : > { %v3988_v18 = vld [vmem:[%s5107_s4 + $0x30] sm:$0xff] (!%p523_p9)   ;;  %v3990_v20 = vld [vmem:[%s5107_s4 + $0x38] sm:$0xff] (!%p523_p9)   ;;  %3630 = vmatprep.mubr.msk.bf16.mxu0 (!%p523_p9), %vm4210_vm0, %v4209_v3  ;;  %3650 = vmatprep.mubr.msk.bf16.mxu1 (!%p523_p9), %vm4210_vm0, %v4209_v3  ;;  %v3121_v28 = vld [vmem:[%s5106_s3] ss:$0 sm:$0xff] (!%p523_p9) }
  0x18   : > { %v3989_v19 = vld [vmem:[%s5109_s6 + $0x30] sm:$0xff] (!%p523_p9)   ;;  %v3991_v21 = vld [vmem:[%s5109_s6 + $0x38] sm:$0xff] (!%p523_p9)   ;;  %v3992_v31 = vld [vmem:[%s5111_s8] sm:$0xff] (!%p523_p9)  }
  0x19   : > { %3617 = vmatpush3.bf16.msra.mxu0 (!%p523_p9), %v3978_v4  ;;  %3637 = vmatpush3.bf16.msra.mxu1 (!%p523_p9), %v3979_v5  ;;  %v3993_v33 = vld [vmem:[%s5111_s8 + $0x8] sm:$0xff] (!%p523_p9)   ;;  %v3994_v34 = vld [vmem:[%s5111_s8 + $0x10] sm:$0xff] (!%p523_p9)   ;;  %v3995_v35 = vld [vmem:[%s5111_s8 + $0x18] sm:$0xff] (!%p523_p9)  }
  0x1a   : > { %3618 = vmatprep.subr.bf16.mxu0 (!%p523_p9), %v4209_v3  ;;  %3638 = vmatprep.subr.bf16.mxu1 (!%p523_p9), %v4209_v3  ;;  %v3996_v36 = vld [vmem:[%s5111_s8 + $0x20] sm:$0xff] (!%p523_p9)   ;;  %v3997_v37 = vld [vmem:[%s5111_s8 + $0x28] sm:$0xff] (!%p523_p9)   ;;  %v3998_v38 = vld [vmem:[%s5111_s8 + $0x30] sm:$0xff] (!%p523_p9)  }
  0x1b   : > { %s4358_s24 = scalar_select %p578_p10, %s4329_s0, 1  ;;  %v3120_v26 = vld [vmem:[%s5138_s19] ss:$0 sm:$0xff]  ;;  %v3999_v39 = vld [vmem:[%s5111_s8 + $0x38] sm:$0xff]   ;;  %v4001_v41 = vld [vmem:[%s5109_s6 + $0x48] sm:$0xff]  }
  0x1c   : > { %v4000_v40 = vld [vmem:[%s5109_s6 + $0x40] sm:$0xff]   ;;  %v4002_v42 = vld [vmem:[%s5109_s6 + $0x50] sm:$0xff]   ;;  %v4003_v43 = vld [vmem:[%s5109_s6 + $0x58] sm:$0xff]   ;;  %s5139_s19 = sld [smem:[#allocation11_spill]] }
  0x1d   : > { %s3119_s25 = sshll.u32 %s4358_s24, 3  ;;  %3619 = vmatpush3.bf16.msra.mxu0 %v3980_v6  ;;  %3639 = vmatpush3.bf16.msra.mxu1 %v3981_v11  ;;  %v4004_v44 = vld [vmem:[%s5109_s6 + $0x60] sm:$0xff]   ;;  %v4005_v45 = vld [vmem:[%s5109_s6 + $0x68] sm:$0xff]   ;;  %v4006_v46 = vld [vmem:[%s5109_s6 + $0x70] sm:$0xff]  }
  0x1e   : > { %s4364_s21 = scalar_lea.vmem %s5137_s20, %s3119_s25  ;;  %3620 = vmatprep.subr.bf16.mxu0 %v4209_v3  ;;  %3640 = vmatprep.subr.bf16.mxu1 %v4209_v3  ;;  %v4007_v47 = vld [vmem:[%s5109_s6 + $0x78] sm:$0xff]   ;;  %v3131_v48 = vld [vmem:[%s5110_s7] ss:$0 sm:$0xff]  ;;  %s3118_s25 = sshll.u32 %s575_s26, 3 }
  0x1f   : > { %v586_v0 = vld [vmem:[%s4364_s21] sm:$0xff]  ;;  %s3033_s20 = scalar_lea.sflag [#allocation3], %s575_s26 }
  0x20   : > { %589 = vadd.xlane.f32.xlu0 %v586_v0  ;;  %v3122_v59 = vld [vmem:[%s5108_s5] ss:$0 sm:$0xff] }
  0x21   : > { %3621 = vmatpush3.bf16.msra.mxu0 %v3982_v12  ;;  %3641 = vmatpush3.bf16.msra.mxu1 %v3983_v13  ;;  %v3140_v63 = vld [vmem:[%s5112_s9] ss:$0 sm:$0xff] }
  0x22   : > { %3622 = vmatprep.subr.bf16.mxu0 %v4209_v3  ;;  %3642 = vmatprep.subr.bf16.mxu1 %v4209_v3  ;;  %s584_s29 = scalar_lea.vmem %s5139_s19, %s4358_s24  ;;  %s577_s24 = scalar_lea.vmem [#allocation2], %s3118_s25 }
  0x23   : > { %s3046_s1 = sshll.u32 %s577_s24, 4  ;;  %s5063_s1 = int_to_ptr.vmem [resolvable:$true] %s3046_s1 }
  0x24   : > { %s4145_s19 = scalar_lea.vmem %s5063_s1, 128 }
  0x25   : > { %3623 = vmatpush3.bf16.msra.mxu0 %v3984_v14  ;;  %3643 = vmatpush3.bf16.msra.mxu1 %v3985_v15  ;;  %p4146_p11 = scmp.ne.s32.totalorder %s5063_s1, %s4145_s19 }
  0x26   : > { %3624 = vmatprep.subr.bf16.mxu0 %v4209_v3  ;;  %3644 = vmatprep.subr.bf16.mxu1 %v4209_v3 }
  0x27   : > { %p4147_p12 = pnand %p4146_p11, %p4346_p5 }
  0x29   : > { %3625 = vmatpush3.bf16.msra.mxu0 %v3986_v16  ;;  %3645 = vmatpush3.bf16.msra.mxu1 %v3987_v17  ;;  %v4546_v16 = vld [vmem:[%s584_s29] ss:$0 sm:$0xff]  ;;  %s3453_s29 = sshll.u32 %s4329_s0, 7  ;;  %p4148_p13 = pneg %p4147_p12 }
  0x2a   : > { %3626 = vmatprep.subr.bf16.mxu0 %v4209_v3  ;;  %3646 = vmatprep.subr.bf16.mxu1 %v4209_v3  ;;  %s5061_s23 = scalar_lea.hbm %s5121_s18, %s3453_s29  ;;  %s4212_s0 = smov [#allocation2]  }
  0x2b   : > { %s4149_s25 = sshll.u32 %s4212_s0, 4  ;;  %s4150_s25 = int_to_ptr.vmem [resolvable:$false] %s4149_s25 }
  0x2c   : > { %p4152_p0 = scmp.lt.s32.totalorder %s5063_s1, %s4150_s25 }
  0x2d   : > { %3627 = vmatpush3.bf16.msra.mxu0 %v3988_v18  ;;  %3647 = vmatpush3.bf16.msra.mxu1 %v3989_v19 }
  0x2e   : > { %3628 = vmatprep.subr.bf16.mxu0 %v4209_v3  ;;  %3648 = vmatprep.subr.bf16.mxu1 %v4209_v3 }
  0x31   : > { %3629 = vmatpush3.bf16.msra.mxu0 %v3990_v20  ;;  %3649 = vmatpush3.bf16.msra.mxu1 %v3991_v21 }
  0x32   : > { %3654 = vmatprep.subr.bf16.mxu0 %v4209_v3  ;;  %3674 = vmatprep.subr.bf16.mxu1 %v4209_v3 }
  0xad   : > { %v590_v7 = vpop.xlane.xlu0 %589 }
  0xae   : > { %v592_v8 = vmul.f32 0.0078125, %v590_v7 }
  0xb0   : > { %v593_v9 = vsub.f32 %v586_v0, %v592_v8  ;;  %v3195_v8 = vld [vmem:[%s5110_s7 + $0x1] ss:$0 sm:$0xff] }
  0xb2   : > { %v594_v10 = vmul.f32 %v593_v9, %v593_v9 }
  0xb4   : > { %595 = vadd.xlane.f32.xlu0 %v594_v10 }
 0x141   : > { %v596_v22 = vpop.xlane.xlu0 %595 }
 0x142   : > { %v597_v23 = vmul.f32 0.0078125, %v596_v22 }
 0x144   : > { %v598_v24 = vadd.f32 1e-06, %v597_v23 }
 0x146   : > { %4120 = vrsqrt.f32 %v598_v24 }
 0x150   : > { %v4121_v25 = vpop.eup %4120 }
 0x151   : > { %v600_v27 = vmul.f32 %v4121_v25, %v593_v9 }
 0x153   : > { %v607_v29 = vmul.f32 %v3120_v26, %v600_v27 }
 0x155   : > { %v614_v30 = vadd.f32 %v3121_v28, %v607_v29 }
 0x157   : > { %v4446_v32 = vpack.c.bf16 %v614_v30, %v614_v30 }
 0x159   : > { %3631 = vmatmul.mubr.bf16.vlgmr.msra.gmra.mrb[0].mxu0 %v4446_v32  ;;  %3651 = vmatmul.mubr.bf16.vlgmr.msra.gmra.mrb[0].mxu1 %v4446_v32 }
 0x15a   : > { %3655 = vmatpush3.bf16.msra.mxu0 %v3992_v31  ;;  %3670 = vmatprep.mubr.msk.bf16.mxu0 %vm4210_vm0, %v4209_v3  ;;  %v4008_v31 = vld [vmem:[%s5107_s4 + $0x40] sm:$0xff]  }
 0x15b   : > { %3656 = vmatprep.subr.bf16.mxu0 %v4209_v3  ;;  %3676 = vmatprep.mubr.msk.bf16.mxu1 %vm4210_vm0, %v4209_v3 }
 0x15e   : > { %3657 = vmatpush3.bf16.msra.mxu0 %v3993_v33 }
 0x15f   : > { %3658 = vmatprep.subr.bf16.mxu0 %v4209_v3 }
 0x162   : > { %3659 = vmatpush3.bf16.msra.mxu0 %v3994_v34  ;;  %v4009_v34 = vld [vmem:[%s5107_s4 + $0x48] sm:$0xff]  }
 0x163   : > { %3660 = vmatprep.subr.bf16.mxu0 %v4209_v3 }
 0x166   : > { %3661 = vmatpush3.bf16.msra.mxu0 %v3995_v35  ;;  %v4010_v35 = vld [vmem:[%s5107_s4 + $0x50] sm:$0xff]  }
 0x167   : > { %3662 = vmatprep.subr.bf16.mxu0 %v4209_v3 }
 0x16a   : > { %3663 = vmatpush3.bf16.msra.mxu0 %v3996_v36  ;;  %v4011_v36 = vld [vmem:[%s5107_s4 + $0x58] sm:$0xff]  }
 0x16b   : > { %3664 = vmatprep.subr.bf16.mxu0 %v4209_v3 }
 0x16e   : > { %3665 = vmatpush3.bf16.msra.mxu0 %v3997_v37  ;;  %v4012_v37 = vld [vmem:[%s5107_s4 + $0x60] sm:$0xff]  }
 0x16f   : > { %3666 = vmatprep.subr.bf16.mxu0 %v4209_v3 }
 0x172   : > { %3667 = vmatpush3.bf16.msra.mxu0 %v3998_v38  ;;  %v4013_v38 = vld [vmem:[%s5107_s4 + $0x68] sm:$0xff]  }
 0x173   : > { %3668 = vmatprep.subr.bf16.mxu0 %v4209_v3 }
 0x176   : > { %3669 = vmatpush3.bf16.msra.mxu0 %v3999_v39  ;;  %v4014_v39 = vld [vmem:[%s5107_s4 + $0x70] sm:$0xff]  }
 0x177   : > { %3706 = vmatprep.subr.bf16.mxu0 %v4209_v3 }
 0x179   : > { %3671 = vmatmul.mubr.bf16.vlgmr.msra.gmra.mrb[4].mxu0 %v4446_v32 }
 0x17a   : > { %3707 = vmatpush3.bf16.msra.mxu0 %v4000_v40  ;;  %3722 = vmatprep.mubr.msk.bf16.mxu0 %vm4210_vm0, %v4209_v3  ;;  %v4015_v40 = vld [vmem:[%s5107_s4 + $0x78] sm:$0xff]  }
 0x17b   : > { %3708 = vmatprep.subr.bf16.mxu0 %v4209_v3 }
 0x17e   : > { %3709 = vmatpush3.bf16.msra.mxu0 %v4001_v41  ;;  %v4016_v41 = vld [vmem:[%s5111_s8 + $0x40] sm:$0xff]  }
 0x17f   : > { %3710 = vmatprep.subr.bf16.mxu0 %v4209_v3 }
 0x182   : > { %3711 = vmatpush3.bf16.msra.mxu0 %v4002_v42  ;;  %v4017_v42 = vld [vmem:[%s5111_s8 + $0x48] sm:$0xff]  }
 0x183   : > { %3712 = vmatprep.subr.bf16.mxu0 %v4209_v3 }
 0x186   : > { %3713 = vmatpush3.bf16.msra.mxu0 %v4003_v43  ;;  %v4018_v43 = vld [vmem:[%s5111_s8 + $0x50] sm:$0xff]  }
 0x187   : > { %3714 = vmatprep.subr.bf16.mxu0 %v4209_v3 }
 0x18a   : > { %3715 = vmatpush3.bf16.msra.mxu0 %v4004_v44  ;;  %v4019_v44 = vld [vmem:[%s5111_s8 + $0x58] sm:$0xff]  }
 0x18b   : > { %3716 = vmatprep.subr.bf16.mxu0 %v4209_v3 }
 0x18e   : > { %3717 = vmatpush3.bf16.msra.mxu0 %v4005_v45  ;;  %v4020_v45 = vld [vmem:[%s5111_s8 + $0x60] sm:$0xff]  }
 0x18f   : > { %3718 = vmatprep.subr.bf16.mxu0 %v4209_v3 }
 0x192   : > { %3719 = vmatpush3.bf16.msra.mxu0 %v4006_v46  ;;  %v4021_v46 = vld [vmem:[%s5111_s8 + $0x68] sm:$0xff]  }
 0x193   : > { %3720 = vmatprep.subr.bf16.mxu0 %v4209_v3 }
 0x196   : > { %3721 = vmatpush3.bf16.msra.mxu0 %v4007_v47  ;;  %v4022_v47 = vld [vmem:[%s5111_s8 + $0x70] sm:$0xff]  }
 0x197   : > { %3746 = vmatprep.subr.bf16.mxu0 %v4209_v3 }
 0x199   : > { %3723 = vmatmul.mubr.bf16.vlgmr.msra.gmra.mrb[8].mxu0 %v4446_v32 }
 0x19a   : > { %3748 = vmatprep.mubr.msk.bf16.mxu0 %vm4210_vm0, %v4209_v3 }
 0x22c   : > { %v722_v49 = vpop.f32.mrb[0].mxu0  ;;  %v833_v50 = vpop.f32.mrb[0].mxu1 }
 0x22d   : > { %v834_v51 = vadd.f32 %v3131_v48, %v833_v50  ;;  %v3632_v52 = vpop.f32.mrb[1].mxu0  ;;  %v3652_v53 = vpop.f32.mrb[1].mxu1  ;;  %v723_v61 = vadd.f32 %v3122_v59, %v722_v49  ;;  %v4023_v48 = vld [vmem:[%s5111_s8 + $0x78] sm:$0xff]   ;;  %v4024_v49 = vld [vmem:[%s5113_s10] sm:$0xff]   ;;  %v4025_v50 = vld [vmem:[%s5113_s10 + $0x8] sm:$0xff]  }
 0x22e   : > { %v725_v54 = vpop.f32.mrb[2].mxu0  ;;  %v836_v55 = vpop.f32.mrb[2].mxu1  ;;  %v4026_v52 = vld [vmem:[%s5109_s6 + $0x80] sm:$0xff]   ;;  %v4029_v59 = vld [vmem:[%s5109_s6 + $0x98] sm:$0xff]  }
 0x22f   : > { %v951_v56 = vpack.c.bf16 %v834_v51, %v834_v51  ;;  %v3633_v57 = vpop.f32.mrb[3].mxu0  ;;  %v3653_v58 = vpop.f32.mrb[3].mxu1  ;;  %v950_v62 = vpack.c.bf16 %v723_v61, %v723_v61  ;;  %v4031_v61 = vld [vmem:[%s5109_s6 + $0xa8] sm:$0xff]  }
 0x230   : > { %v4027_v57 = vld [vmem:[%s5109_s6 + $0x88] sm:$0xff]   ;;  %v4028_v58 = vld [vmem:[%s5109_s6 + $0x90] sm:$0xff]  }
 0x231   : > { %v963_v60 = vsel %vm958_vm1, %v951_v56, 0 }
 0x232   : > { %3675 = vmatpush3.bf16.xpose.msra.mxu1 %v963_v60  ;;  %v4030_v60 = vld [vmem:[%s5109_s6 + $0xa0] sm:$0xff]  }
 0x233   : > { %3680 = vmatprep.subr.bf16.mxu1 %v4209_v3 }
 0x239   : > { %3677 = vmatmul.mubr.msk.bf16.vlgmr.msra.gmra.mrb[4].mxu1 %vm958_vm1, %v950_v62  ;;  %v4032_v62 = vld [vmem:[%s5109_s6 + $0xb0] sm:$0xff]  }
 0x23a   : > { %3682 = vmatprep.mubr.msk.bf16.mxu1 %vm4210_vm0, %v4209_v3 }
 0x24c   : > { %v944_v0 = vpop.f32.mrb[4].mxu0 }
 0x24d   : > { %v945_v1 = vadd.f32 %v3140_v63, %v944_v0  ;;  %v3672_v2 = vpop.f32.mrb[5].mxu0  ;;  %v4033_v63 = vld [vmem:[%s5109_s6 + $0xb8] sm:$0xff]   ;;  %v3169_v0 = vld [vmem:[%s5108_s5 + $0x1] ss:$0 sm:$0xff] }
 0x24e   : > { %v947_v4 = vpop.f32.mrb[6].mxu0 }
 0x24f   : > { %v1018_v5 = vpack.c.bf16 %v945_v1, %v945_v1  ;;  %v3673_v6 = vpop.f32.mrb[7].mxu0 }
 0x251   : > { %v1024_v7 = vsel %vm1022_vm2, %v1018_v5, 0 }
 0x252   : > { %3681 = vmatpush3.bf16.msra.mxu1 %v1024_v7 }
 0x253   : > { %3686 = vmatprep.subr.bf16.mxu1 %v4209_v3 }
 0x26c   : > { %v1291_v9 = vpop.f32.mrb[8].mxu0 }
 0x26d   : > { %v1292_v10 = vadd.f32 %v3195_v8, %v1291_v9  ;;  %v3724_v11 = vpop.f32.mrb[9].mxu0  ;;  %v3221_v8 = vld [vmem:[%s5112_s9 + $0x1] ss:$0 sm:$0xff] }
 0x26e   : > { %v1294_v12 = vpop.f32.mrb[10].mxu0 }
 0x26f   : > { %v1411_v13 = vpack.c.bf16 %v1292_v10, %v1292_v10  ;;  %v3725_v14 = vpop.f32.mrb[11].mxu0 }
 0x271   : > { %v1416_v15 = vsel %vm958_vm1, %v1411_v13, 0 }
 0x272   : > { %3747 = vmatpush3.bf16.xpose.msra.mxu0 %v1416_v15 }
 0x273   : > { %3752 = vmatprep.subr.bf16.mxu0 %v4209_v3 }
 0x30c   : > { %v999_v17 = vpop.f32.mrb[4].mxu1 }
 0x30d   : > { %v1000_v18 = vadd.f32 %v4546_v16, %v999_v17  ;;  %v3678_v19 = vpop.f32.mrb[5].mxu1 }
 0x30e   : > { %v1002_v20 = vpop.f32.mrb[6].mxu1 }
 0x30f   : > { %v3679_v21 = vpop.f32.mrb[7].mxu1  ;;  %v1006_v22 = vsel %vm1005_vm3, %v1000_v18, -inf }
 0x310   : > { %1007 = vmax.xlane.f32.xlu1 %v1006_v22  ;;  %v3285_v21 = vld [vmem:[%s5110_s7 + $0x2] ss:$0 sm:$0xff] }
 0x39d   : > { %v1008_v23 = vpop.xlane.xlu1 %1007 }
 0x39e   : > { %v1009_v24 = vsub.f32 %v1000_v18, %v1008_v23 }
 0x3a0   : > { %v1010_v25 = vmul.f32 1.442695, %v1009_v24 }
 0x3a2   : > { %4122 = vpow2.f32 %v1010_v25 }
 0x3ac   : > { %v4123_v26 = vpop.eup %4122 }
 0x3ad   : > { %v1012_v27 = vsel %vm1005_vm3, %v4123_v26, 0.0 }
 0x3ae   : > { %1013 = vadd.xlane.f32.xlu1 %v1012_v27 }
 0x43b   : > { %v1014_v28 = vpop.xlane.xlu1 %1013 }
 0x43c   : > { %4124 = vrcp.f32 %v1014_v28 }
 0x446   : > { %v4125_v29 = vpop.eup %4124 }
 0x447   : > { %v1016_v30 = vmul.f32 %v4125_v29, %v4123_v26 }
 0x449   : > { %v1017_v33 = vpack.c.bf16 %v1016_v30, %v1016_v30 }
 0x44b   : > { %3683 = vmatmul.mubr.msk.bf16.vlgmr.msra.gmra.mrb[8].mxu1 %vm1005_vm3, %v1017_v33 }
 0x44c   : > { %3687 = vmatpush3.bf16.msra.mxu1 %v4008_v31  ;;  %3702 = vmatprep.mubr.msk.bf16.mxu1 %vm4210_vm0, %v4209_v3 }
 0x44d   : > { %3688 = vmatprep.subr.bf16.mxu1 %v4209_v3 }
 0x450   : > { %3689 = vmatpush3.bf16.msra.mxu1 %v4009_v34 }
 0x451   : > { %3690 = vmatprep.subr.bf16.mxu1 %v4209_v3 }
 0x454   : > { %3691 = vmatpush3.bf16.msra.mxu1 %v4010_v35 }
 0x455   : > { %3692 = vmatprep.subr.bf16.mxu1 %v4209_v3 }
 0x458   : > { %3693 = vmatpush3.bf16.msra.mxu1 %v4011_v36 }
 0x459   : > { %3694 = vmatprep.subr.bf16.mxu1 %v4209_v3 }
 0x45c   : > { %3695 = vmatpush3.bf16.msra.mxu1 %v4012_v37 }
 0x45d   : > { %3696 = vmatprep.subr.bf16.mxu1 %v4209_v3 }
 0x460   : > { %3697 = vmatpush3.bf16.msra.mxu1 %v4013_v38 }
 0x461   : > { %3698 = vmatprep.subr.bf16.mxu1 %v4209_v3 }
 0x464   : > { %3699 = vmatpush3.bf16.msra.mxu1 %v4014_v39 }
 0x465   : > { %3700 = vmatprep.subr.bf16.mxu1 %v4209_v3 }
 0x468   : > { %3701 = vmatpush3.bf16.msra.mxu1 %v4015_v40 }
 0x469   : > { %3726 = vmatprep.subr.bf16.mxu1 %v4209_v3 }
 0x46b   : > { %3703 = vmatmul.mubr.bf16.vlgmr.msra.gmra.mrb[12].mxu1 %v4446_v32 }
 0x46c   : > { %3727 = vmatpush3.bf16.msra.mxu1 %v4016_v41  ;;  %3742 = vmatprep.mubr.msk.bf16.mxu1 %vm4210_vm0, %v4209_v3 }
 0x46d   : > { %3728 = vmatprep.subr.bf16.mxu1 %v4209_v3 }
 0x470   : > { %3729 = vmatpush3.bf16.msra.mxu1 %v4017_v42 }
 0x471   : > { %3730 = vmatprep.subr.bf16.mxu1 %v4209_v3 }
 0x474   : > { %3731 = vmatpush3.bf16.msra.mxu1 %v4018_v43 }
 0x475   : > { %3732 = vmatprep.subr.bf16.mxu1 %v4209_v3 }
 0x478   : > { %3733 = vmatpush3.bf16.msra.mxu1 %v4019_v44  ;;  %v4034_v44 = vld [vmem:[%s5113_s10 + $0x10] sm:$0xff]  }
 0x479   : > { %3734 = vmatprep.subr.bf16.mxu1 %v4209_v3 }
 0x47c   : > { %3735 = vmatpush3.bf16.msra.mxu1 %v4020_v45 }
 0x47d   : > { %3736 = vmatprep.subr.bf16.mxu1 %v4209_v3 }
 0x480   : > { %3737 = vmatpush3.bf16.msra.mxu1 %v4021_v46  ;;  %v4035_v46 = vld [vmem:[%s5113_s10 + $0x18] sm:$0xff]  }
 0x481   : > { %3738 = vmatprep.subr.bf16.mxu1 %v4209_v3 }
 0x484   : > { %3739 = vmatpush3.bf16.msra.mxu1 %v4022_v47 }
 0x485   : > { %3740 = vmatprep.subr.bf16.mxu1 %v4209_v3 }
 0x488   : > { %3741 = vmatpush3.bf16.msra.mxu1 %v4023_v48  ;;  %v4036_v48 = vld [vmem:[%s5107_s4 + $0x80] sm:$0xff]  }
 0x489   : > { %3766 = vmatprep.subr.bf16.mxu1 %v4209_v3 }
 0x48b   : > { %3743 = vmatmul.mubr.bf16.vlgmr.msra.gmra.mrb[16].mxu1 %v4446_v32 }
 0x48c   : > { %3767 = vmatpush3.bf16.msra.mxu1 %v4024_v49  ;;  %3770 = vmatprep.mubr.msk.bf16.mxu1 %vm4210_vm0, %v4209_v3 }
 0x48d   : > { %3768 = vmatprep.subr.bf16.mxu1 %v4209_v3 }
 0x490   : > { %3769 = vmatpush3.bf16.msra.mxu1 %v4025_v50 }
 0x491   : > { %3794 = vmatprep.subr.bf16.mxu1 %v4209_v3 }
 0x51e   : > { %v1060_v51 = vpop.f32.mrb[8].mxu1 }
 0x51f   : > { %v1066_v53 = vpack.c.bf16 %v1060_v51, %v1060_v51  ;;  %v3684_v54 = vpop.f32.mrb[9].mxu1 }
 0x520   : > { %v1063_v55 = vpop.f32.mrb[10].mxu1  ;;  %v4038_v54 = vld [vmem:[%s5107_s4 + $0x90] sm:$0xff]  }
 0x521   : > { %v3685_v56 = vpop.f32.mrb[11].mxu1  ;;  %3771 = vmatmul.mubr.msk.bf16.vlgmr.msra.gmra.mrb[20].mxu1 %vm958_vm1, %v1066_v53  ;;  %v4037_v53 = vld [vmem:[%s5107_s4 + $0x88] sm:$0xff]   ;;  %v4039_v55 = vld [vmem:[%s5107_s4 + $0x98] sm:$0xff]  }
 0x522   : > { %3795 = vmatpush3.bf16.msra.mxu1 %v4026_v52  ;;  %3810 = vmatprep.mubr.msk.bf16.mxu1 %vm4210_vm0, %v4209_v3  ;;  %v4040_v56 = vld [vmem:[%s5107_s4 + $0xa0] sm:$0xff]  }
 0x523   : > { %3796 = vmatprep.subr.bf16.mxu1 %v4209_v3 }
 0x526   : > { %3797 = vmatpush3.bf16.msra.mxu1 %v4027_v57  ;;  %v4041_v57 = vld [vmem:[%s5107_s4 + $0xa8] sm:$0xff]  }
 0x527   : > { %3798 = vmatprep.subr.bf16.mxu1 %v4209_v3 }
 0x52a   : > { %3799 = vmatpush3.bf16.msra.mxu1 %v4028_v58  ;;  %v4042_v58 = vld [vmem:[%s5107_s4 + $0xb0] sm:$0xff]  }
 0x52b   : > { %3800 = vmatprep.subr.bf16.mxu1 %v4209_v3 }
 0x52e   : > { %3801 = vmatpush3.bf16.msra.mxu1 %v4029_v59  ;;  %v4043_v59 = vld [vmem:[%s5107_s4 + $0xb8] sm:$0xff]  }
 0x52f   : > { %3802 = vmatprep.subr.bf16.mxu1 %v4209_v3 }
 0x532   : > { %3803 = vmatpush3.bf16.msra.mxu1 %v4030_v60  ;;  %v4044_v60 = vld [vmem:[%s5111_s8 + $0x80] sm:$0xff]  }
 0x533   : > { %3804 = vmatprep.subr.bf16.mxu1 %v4209_v3 }
 0x536   : > { %3805 = vmatpush3.bf16.msra.mxu1 %v4031_v61  ;;  %v4045_v61 = vld [vmem:[%s5111_s8 + $0x88] sm:$0xff]  }
 0x537   : > { %3806 = vmatprep.subr.bf16.mxu1 %v4209_v3 }
 0x53a   : > { %3807 = vmatpush3.bf16.msra.mxu1 %v4032_v62  ;;  %v4046_v62 = vld [vmem:[%s5111_s8 + $0x90] sm:$0xff]  }
 0x53b   : > { %3808 = vmatprep.subr.bf16.mxu1 %v4209_v3 }
 0x53e   : > { %v1178_v1 = vpop.f32.mrb[12].mxu1  ;;  %3809 = vmatpush3.bf16.msra.mxu1 %v4033_v63  ;;  %v4047_v63 = vld [vmem:[%s5111_s8 + $0x98] sm:$0xff]  }
 0x53f   : > { %v1179_v2 = vadd.f32 %v3169_v0, %v1178_v1  ;;  %v3704_v4 = vpop.f32.mrb[13].mxu1  ;;  %3834 = vmatprep.subr.bf16.mxu1 %v4209_v3  ;;  %v4048_v0 = vld [vmem:[%s5111_s8 + $0xa0] sm:$0xff]   ;;  %v4049_v1 = vld [vmem:[%s5111_s8 + $0xa8] sm:$0xff]  }
 0x540   : > { %v1181_v5 = vpop.f32.mrb[14].mxu1  ;;  %v4051_v4 = vld [vmem:[%s5111_s8 + $0xb8] sm:$0xff]  }
 0x541   : > { %v1410_v6 = vpack.c.bf16 %v1179_v2, %v1179_v2  ;;  %v3705_v7 = vpop.f32.mrb[15].mxu1  ;;  %3811 = vmatmul.mubr.bf16.vlgmr.msra.gmra.mrb[24].mxu1 %v4446_v32  ;;  %v4050_v2 = vld [vmem:[%s5111_s8 + $0xb0] sm:$0xff]   ;;  %v4052_v5 = vld [vmem:[%s5109_s6 + $0xc0] sm:$0xff]  }
 0x542   : > { %3836 = vmatprep.mubr.msk.bf16.mxu1 %vm4210_vm0, %v4209_v3  ;;  %v4054_v7 = vld [vmem:[%s5109_s6 + $0xd0] sm:$0xff]  }
 0x543   : > { %3749 = vmatmul.mubr.msk.bf16.vlgmr.msra.gmra.mrb[12].mxu0 %vm958_vm1, %v1410_v6  ;;  %v4053_v6 = vld [vmem:[%s5109_s6 + $0xc8] sm:$0xff]  }
 0x544   : > { %3754 = vmatprep.mubr.msk.bf16.mxu0 %vm4210_vm0, %v4209_v3 }
 0x55e   : > { %v1404_v9 = vpop.f32.mrb[16].mxu1 }
 0x55f   : > { %v1405_v10 = vadd.f32 %v3221_v8, %v1404_v9  ;;  %v3744_v11 = vpop.f32.mrb[17].mxu1  ;;  %v4055_v8 = vld [vmem:[%s5109_s6 + $0xd8] sm:$0xff]   ;;  %v4056_v9 = vld [vmem:[%s5109_s6 + $0xe0] sm:$0xff]  }
 0x560   : > { %v1407_v12 = vpop.f32.mrb[18].mxu1  ;;  %v4058_v11 = vld [vmem:[%s5109_s6 + $0xf0] sm:$0xff]  }
 0x561   : > { %v1470_v13 = vpack.c.bf16 %v1405_v10, %v1405_v10  ;;  %v3745_v14 = vpop.f32.mrb[19].mxu1  ;;  %v4057_v10 = vld [vmem:[%s5109_s6 + $0xe8] sm:$0xff]   ;;  %v4059_v12 = vld [vmem:[%s5109_s6 + $0xf8] sm:$0xff]  }
 0x563   : > { %v1475_v15 = vsel %vm1022_vm2, %v1470_v13, 0 }
 0x564   : > { %3753 = vmatpush3.bf16.msra.mxu0 %v1475_v15 }
 0x565   : > { %3758 = vmatprep.subr.bf16.mxu0 %v4209_v3 }
 0x5f4   : > { %v4681_v17 = vpop.f32.mrb[20].mxu1 }
 0x5f5   : > { %v3772_v18 = vpop.f32.mrb[21].mxu1 }
 0x5f6   : > { %v1630_v19 = vpop.f32.mrb[22].mxu1 }
 0x5f7   : > { %v3773_v20 = vpop.f32.mrb[23].mxu1 }
 0x5f8   : > { %v3259_v20 = vld [vmem:[%s5108_s5 + $0x2] ss:$0 sm:$0xff] }
 0x614   : > { %v1853_v22 = vpop.f32.mrb[24].mxu1 }
 0x615   : > { %v1854_v23 = vadd.f32 %v3285_v21, %v1853_v22  ;;  %v3812_v24 = vpop.f32.mrb[25].mxu1 }
 0x616   : > { %v1452_v25 = vpop.f32.mrb[12].mxu0  ;;  %v1856_v26 = vpop.f32.mrb[26].mxu1 }
 0x617   : > { %v1973_v27 = vpack.c.bf16 %v1854_v23, %v1854_v23  ;;  %v1453_v28 = vadd.f32 %v4546_v16, %v1452_v25  ;;  %v3750_v29 = vpop.f32.mrb[13].mxu0  ;;  %v3813_v30 = vpop.f32.mrb[27].mxu1 }
 0x618   : > { %v1455_v31 = vpop.f32.mrb[14].mxu0 }
 0x619   : > { %v1978_v33 = vsel %vm958_vm1, %v1973_v27, 0  ;;  %v3751_v34 = vpop.f32.mrb[15].mxu0  ;;  %v1458_v35 = vsel %vm1005_vm3, %v1453_v28, -inf }
 0x61a   : > { %3835 = vmatpush3.bf16.xpose.msra.mxu1 %v1978_v33  ;;  %1459 = vmax.xlane.f32.xlu0 %v1458_v35  ;;  %v3372_v35 = vld [vmem:[%s5110_s7 + $0x3] ss:$0 sm:$0xff] }
 0x61b   : > { %3840 = vmatprep.subr.bf16.mxu1 %v4209_v3 }
 0x6a7   : > { %v1460_v36 = vpop.xlane.xlu0 %1459 }
 0x6a8   : > { %v1461_v37 = vsub.f32 %v1453_v28, %v1460_v36 }
 0x6aa   : > { %v1462_v38 = vmul.f32 1.442695, %v1461_v37 }
 0x6ac   : > { %4126 = vpow2.f32 %v1462_v38 }
 0x6b6   : > { %v4127_v39 = vpop.eup %4126 }
 0x6b7   : > { %v1464_v40 = vsel %vm1005_vm3, %v4127_v39, 0.0 }
 0x6b8   : > { %1465 = vadd.xlane.f32.xlu1 %v1464_v40 }
 0x745   : > { %v1466_v41 = vpop.xlane.xlu1 %1465 }
 0x746   : > { %4128 = vrcp.f32 %v1466_v41 }
 0x750   : > { %v4129_v42 = vpop.eup %4128 }
 0x751   : > { %v1468_v43 = vmul.f32 %v4129_v42, %v4127_v39 }
 0x753   : > { %v1469_v45 = vpack.c.bf16 %v1468_v43, %v1468_v43 }
 0x755   : > { %3755 = vmatmul.mubr.msk.bf16.vlgmr.msra.gmra.mrb[16].mxu0 %vm1005_vm3, %v1469_v45 }
 0x756   : > { %3759 = vmatpush3.bf16.msra.mxu0 %v4034_v44  ;;  %3762 = vmatprep.mubr.msk.bf16.mxu0 %vm4210_vm0, %v4209_v3 }
 0x757   : > { %3760 = vmatprep.subr.bf16.mxu0 %v4209_v3 }
 0x75a   : > { %3761 = vmatpush3.bf16.msra.mxu0 %v4035_v46 }
 0x75b   : > { %3774 = vmatprep.subr.bf16.mxu0 %v4209_v3 }
 0x828   : > { %v1511_v47 = vpop.f32.mrb[16].mxu0 }
 0x829   : > { %v1517_v49 = vpack.c.bf16 %v1511_v47, %v1511_v47  ;;  %v3756_v50 = vpop.f32.mrb[17].mxu0 }
 0x82a   : > { %v1514_v51 = vpop.f32.mrb[18].mxu0 }
 0x82b   : > { %v3757_v52 = vpop.f32.mrb[19].mxu0  ;;  %3763 = vmatmul.mubr.msk.bf16.vlgmr.msra.gmra.mrb[20].mxu0 %vm958_vm1, %v1517_v49 }
 0x82c   : > { %3775 = vmatpush3.bf16.msra.mxu0 %v4036_v48  ;;  %3790 = vmatprep.mubr.msk.bf16.mxu0 %vm4210_vm0, %v4209_v3 }
 0x82d   : > { %3776 = vmatprep.subr.bf16.mxu0 %v4209_v3 }
 0x830   : > { %3777 = vmatpush3.bf16.msra.mxu0 %v4037_v53 }
 0x831   : > { %3778 = vmatprep.subr.bf16.mxu0 %v4209_v3 }
 0x834   : > { %3779 = vmatpush3.bf16.msra.mxu0 %v4038_v54 }
 0x835   : > { %3780 = vmatprep.subr.bf16.mxu0 %v4209_v3 }
 0x838   : > { %3781 = vmatpush3.bf16.msra.mxu0 %v4039_v55 }
 0x839   : > { %3782 = vmatprep.subr.bf16.mxu0 %v4209_v3 }
 0x83c   : > { %3783 = vmatpush3.bf16.msra.mxu0 %v4040_v56 }
 0x83d   : > { %3784 = vmatprep.subr.bf16.mxu0 %v4209_v3 }
 0x840   : > { %3785 = vmatpush3.bf16.msra.mxu0 %v4041_v57  ;;  %v4060_v57 = vld [vmem:[%s5113_s10 + $0x20] sm:$0xff]  }
 0x841   : > { %3786 = vmatprep.subr.bf16.mxu0 %v4209_v3 }
 0x844   : > { %3787 = vmatpush3.bf16.msra.mxu0 %v4042_v58 }
 0x845   : > { %3788 = vmatprep.subr.bf16.mxu0 %v4209_v3 }
 0x848   : > { %3789 = vmatpush3.bf16.msra.mxu0 %v4043_v59  ;;  %v4061_v59 = vld [vmem:[%s5113_s10 + $0x28] sm:$0xff]  }
 0x849   : > { %3814 = vmatprep.subr.bf16.mxu0 %v4209_v3 }
 0x84b   : > { %3791 = vmatmul.mubr.bf16.vlgmr.msra.gmra.mrb[24].mxu0 %v4446_v32 }
 0x84c   : > { %3815 = vmatpush3.bf16.msra.mxu0 %v4044_v60  ;;  %3830 = vmatprep.mubr.msk.bf16.mxu0 %vm4210_vm0, %v4209_v3 }
 0x84d   : > { %3816 = vmatprep.subr.bf16.mxu0 %v4209_v3 }
 0x850   : > { %3817 = vmatpush3.bf16.msra.mxu0 %v4045_v61  ;;  %v4062_v61 = vld [vmem:[%s5107_s4 + $0xc0] sm:$0xff]  }
 0x851   : > { %3818 = vmatprep.subr.bf16.mxu0 %v4209_v3 }
 0x854   : > { %3819 = vmatpush3.bf16.msra.mxu0 %v4046_v62 }
 0x855   : > { %3820 = vmatprep.subr.bf16.mxu0 %v4209_v3 }
 0x858   : > { %3821 = vmatpush3.bf16.msra.mxu0 %v4047_v63 }
 0x859   : > { %3822 = vmatprep.subr.bf16.mxu0 %v4209_v3 }
 0x85c   : > { %3823 = vmatpush3.bf16.msra.mxu0 %v4048_v0 }
 0x85d   : > { %3824 = vmatprep.subr.bf16.mxu0 %v4209_v3 }
 0x860   : > { %3825 = vmatpush3.bf16.msra.mxu0 %v4049_v1 }
 0x861   : > { %3826 = vmatprep.subr.bf16.mxu0 %v4209_v3 }
 0x864   : > { %3827 = vmatpush3.bf16.msra.mxu0 %v4050_v2  ;;  %v4063_v2 = vld [vmem:[%s5107_s4 + $0xc8] sm:$0xff]  }
 0x865   : > { %3828 = vmatprep.subr.bf16.mxu0 %v4209_v3 }
 0x868   : > { %3829 = vmatpush3.bf16.msra.mxu0 %v4051_v4  ;;  %v4064_v4 = vld [vmem:[%s5107_s4 + $0xd0] sm:$0xff]  }
 0x869   : > { %3874 = vmatprep.subr.bf16.mxu0 %v4209_v3 }
 0x86b   : > { %3831 = vmatmul.mubr.bf16.vlgmr.msra.gmra.mrb[28].mxu0 %v4446_v32 }
 0x86c   : > { %3875 = vmatpush3.bf16.msra.mxu0 %v4052_v5  ;;  %3890 = vmatprep.mubr.msk.bf16.mxu0 %vm4210_vm0, %v4209_v3  ;;  %v4065_v5 = vld [vmem:[%s5107_s4 + $0xd8] sm:$0xff]  }
 0x86d   : > { %3876 = vmatprep.subr.bf16.mxu0 %v4209_v3 }
 0x870   : > { %3877 = vmatpush3.bf16.msra.mxu0 %v4053_v6  ;;  %v4066_v6 = vld [vmem:[%s5107_s4 + $0xe0] sm:$0xff]  }
 0x871   : > { %3878 = vmatprep.subr.bf16.mxu0 %v4209_v3 }
 0x874   : > { %3879 = vmatpush3.bf16.msra.mxu0 %v4054_v7  ;;  %v4067_v7 = vld [vmem:[%s5107_s4 + $0xe8] sm:$0xff]  }
 0x875   : > { %3880 = vmatprep.subr.bf16.mxu0 %v4209_v3 }
 0x878   : > { %3881 = vmatpush3.bf16.msra.mxu0 %v4055_v8  ;;  %v4068_v8 = vld [vmem:[%s5107_s4 + $0xf0] sm:$0xff]  }
 0x879   : > { %3882 = vmatprep.subr.bf16.mxu0 %v4209_v3 }
 0x87c   : > { %3883 = vmatpush3.bf16.msra.mxu0 %v4056_v9  ;;  %v4069_v9 = vld [vmem:[%s5107_s4 + $0xf8] sm:$0xff]  }
 0x87d   : > { %3884 = vmatprep.subr.bf16.mxu0 %v4209_v3 }
 0x880   : > { %3885 = vmatpush3.bf16.msra.mxu0 %v4057_v10  ;;  %v4070_v10 = vld [vmem:[%s5111_s8 + $0xc0] sm:$0xff]  }
 0x881   : > { %3886 = vmatprep.subr.bf16.mxu0 %v4209_v3 }
 0x884   : > { %3887 = vmatpush3.bf16.msra.mxu0 %v4058_v11  ;;  %v4071_v11 = vld [vmem:[%s5111_s8 + $0xc8] sm:$0xff]  }
 0x885   : > { %3888 = vmatprep.subr.bf16.mxu0 %v4209_v3 }
 0x888   : > { %3889 = vmatpush3.bf16.msra.mxu0 %v4059_v12  ;;  %v4072_v12 = vld [vmem:[%s5111_s8 + $0xd0] sm:$0xff]  }
 0x889   : > { %3914 = vmatprep.subr.bf16.mxu0 %v4209_v3 }
 0x88b   : > { %3891 = vmatmul.mubr.bf16.vlgmr.msra.gmra.mrb[32].mxu0 %v4446_v32 }
 0x88c   : > { %3916 = vmatprep.mubr.msk.bf16.mxu0 %vm4210_vm0, %v4209_v3 }
 0x8fe   : > { %v1572_v13 = vpop.f32.mrb[20].mxu0 }
 0x8ff   : > { %v4811_v14 = vadd.f32 %v4681_v17, %v1572_v13  ;;  %v3764_v15 = vpop.f32.mrb[21].mxu0  ;;  %v3311_v17 = vld [vmem:[%s5112_s9 + $0x2] ss:$0 sm:$0xff]  ;;  %v4073_v13 = vld [vmem:[%s5111_s8 + $0xd8] sm:$0xff]  }
 0x900   : > { %v1575_v18 = vpop.f32.mrb[22].mxu0  ;;  %v4074_v15 = vld [vmem:[%s5111_s8 + $0xe0] sm:$0xff]  }
 0x901   : > { %v3765_v19 = vpop.f32.mrb[23].mxu0  ;;  %v4075_v18 = vld [vmem:[%s5111_s8 + $0xe8] sm:$0xff]  }
 0x902   : > { %v4076_v19 = vld [vmem:[%s5111_s8 + $0xf0] sm:$0xff]  }
 0x91e   : > { %v1740_v21 = vpop.f32.mrb[24].mxu0 }
 0x91f   : > { %v1741_v22 = vadd.f32 %v3259_v20, %v1740_v21  ;;  %v3792_v23 = vpop.f32.mrb[25].mxu0  ;;  %v4077_v20 = vld [vmem:[%s5111_s8 + $0xf8] sm:$0xff]  }
 0x920   : > { %v1743_v24 = vpop.f32.mrb[26].mxu0 }
 0x921   : > { %v1972_v25 = vpack.c.bf16 %v1741_v22, %v1741_v22  ;;  %v3793_v26 = vpop.f32.mrb[27].mxu0 }
 0x922   : > { %v3346_v26 = vld [vmem:[%s5108_s5 + $0x3] ss:$0 sm:$0xff] }
 0x923   : > { %3837 = vmatmul.mubr.msk.bf16.vlgmr.msra.gmra.mrb[28].mxu1 %vm958_vm1, %v1972_v25 }
 0x924   : > { %3842 = vmatprep.mubr.msk.bf16.mxu1 %vm4210_vm0, %v4209_v3 }
 0x93e   : > { %v1966_v27 = vpop.f32.mrb[28].mxu0 }
 0x93f   : > { %v1967_v28 = vadd.f32 %v3311_v17, %v1966_v27  ;;  %v3832_v29 = vpop.f32.mrb[29].mxu0 }
 0x940   : > { %v1969_v30 = vpop.f32.mrb[30].mxu0 }
 0x941   : > { %v2032_v31 = vpack.c.bf16 %v1967_v28, %v1967_v28  ;;  %v3833_v33 = vpop.f32.mrb[31].mxu0 }
 0x943   : > { %v2037_v34 = vsel %vm1022_vm2, %v2032_v31, 0 }
 0x944   : > { %3841 = vmatpush3.bf16.msra.mxu1 %v2037_v34 }
 0x945   : > { %3846 = vmatprep.subr.bf16.mxu1 %v4209_v3 }
 0x95e   : > { %v2361_v36 = vpop.f32.mrb[32].mxu0 }
 0x95f   : > { %v2362_v37 = vadd.f32 %v3372_v35, %v2361_v36  ;;  %v3892_v38 = vpop.f32.mrb[33].mxu0 }
 0x960   : > { %v2364_v39 = vpop.f32.mrb[34].mxu0 }
 0x961   : > { %v2481_v40 = vpack.c.bf16 %v2362_v37, %v2362_v37  ;;  %v3893_v41 = vpop.f32.mrb[35].mxu0 }
 0x963   : > { %v2486_v42 = vsel %vm958_vm1, %v2481_v40, 0 }
 0x964   : > { %3915 = vmatpush3.bf16.xpose.msra.mxu0 %v2486_v42 }
 0x965   : > { %3920 = vmatprep.subr.bf16.mxu0 %v4209_v3 }
 0x9f6   : > { %v2014_v43 = vpop.f32.mrb[28].mxu1 }
 0x9f7   : > { %v2015_v44 = vadd.f32 %v4546_v16, %v2014_v43  ;;  %v3838_v45 = vpop.f32.mrb[29].mxu1 }
 0x9f8   : > { %v2017_v46 = vpop.f32.mrb[30].mxu1 }
 0x9f9   : > { %v3839_v47 = vpop.f32.mrb[31].mxu1  ;;  %v2020_v48 = vsel %vm1005_vm3, %v2015_v44, -inf }
 0x9fa   : > { %2021 = vmax.xlane.f32.xlu0 %v2020_v48 }
 0xa87   : > { %v2022_v49 = vpop.xlane.xlu0 %2021 }
 0xa88   : > { %v2023_v50 = vsub.f32 %v2015_v44, %v2022_v49 }
 0xa8a   : > { %v2024_v51 = vmul.f32 1.442695, %v2023_v50 }
 0xa8c   : > { %4130 = vpow2.f32 %v2024_v51 }
 0xa96   : > { %v4131_v52 = vpop.eup %4130 }
 0xa97   : > { %v2026_v53 = vsel %vm1005_vm3, %v4131_v52, 0.0 }
 0xa98   : > { %2027 = vadd.xlane.f32.xlu1 %v2026_v53 }
 0xb25   : > { %v2028_v54 = vpop.xlane.xlu1 %2027 }
 0xb26   : > { %4132 = vrcp.f32 %v2028_v54  ;;  %v4079_v54 = vld [vmem:[%s5113_s10 + $0x38] sm:$0xff]  }
 0xb30   : > { %v4133_v55 = vpop.eup %4132 }
 0xb31   : > { %v2030_v56 = vmul.f32 %v4133_v55, %v4131_v52 }
 0xb33   : > { %v2031_v58 = vpack.c.bf16 %v2030_v56, %v2030_v56 }
 0xb35   : > { %3843 = vmatmul.mubr.msk.bf16.vlgmr.msra.gmra.mrb[32].mxu1 %vm1005_vm3, %v2031_v58 }
 0xb36   : > { %3847 = vmatpush3.bf16.msra.mxu1 %v4060_v57  ;;  %3850 = vmatprep.mubr.msk.bf16.mxu1 %vm4210_vm0, %v4209_v3 }
 0xb37   : > { %3848 = vmatprep.subr.bf16.mxu1 %v4209_v3 }
 0xb3a   : > { %3849 = vmatpush3.bf16.msra.mxu1 %v4061_v59 }
 0xb3b   : > { %3854 = vmatprep.subr.bf16.mxu1 %v4209_v3 }
 0xc08   : > { %v2073_v60 = vpop.f32.mrb[32].mxu1 }
 0xc09   : > { %v2079_v62 = vpack.c.bf16 %v2073_v60, %v2073_v60  ;;  %v3844_v63 = vpop.f32.mrb[33].mxu1 }
 0xc0a   : > { %v2076_v0 = vpop.f32.mrb[34].mxu1 }
 0xc0b   : > { %v3845_v1 = vpop.f32.mrb[35].mxu1  ;;  %3851 = vmatmul.mubr.msk.bf16.vlgmr.msra.gmra.mrb[36].mxu1 %vm958_vm1, %v2079_v62 }
 0xc0c   : > { %3855 = vmatpush3.bf16.msra.mxu1 %v4062_v61  ;;  %3870 = vmatprep.mubr.msk.bf16.mxu1 %vm4210_vm0, %v4209_v3  ;;  %v3416_v61 = vld [vmem:[%s5114_s11] ss:$0 sm:$0xff] }
 0xc0d   : > { %3856 = vmatprep.subr.bf16.mxu1 %v4209_v3 }
 0xc10   : > { %3857 = vmatpush3.bf16.msra.mxu1 %v4063_v2  ;;  %v4144_v2 = vld [vmem:[%s4364_s21] sm:$0xff]  ;;  %s4151_s21 = scalar_lea.vmem %s4150_s25, 256 }
 0xc11   : > { %3858 = vmatprep.subr.bf16.mxu1 %v4209_v3  ;;  %p4153_p1 = scmp.lt.s32.totalorder %s4151_s21, %s4145_s19 }
 0xc13   : > { %p4154_p2 = por %p4153_p1, %p4152_p0 }
 0xc14   : > { %3859 = vmatpush3.bf16.msra.mxu1 %v4064_v4 }
 0xc15   : > { %3860 = vmatprep.subr.bf16.mxu1 %v4209_v3  ;;  %p4155_p3 = pnand %p4154_p2, %p4148_p13 }
 0xc18   : > { %3861 = vmatpush3.bf16.msra.mxu1 %v4065_v5  ;;  %v4080_v5 = vld [vmem:[%s5117_s14] ss:$8 sps:$4 sm:$0xff]  }
 0xc19   : > { %3862 = vmatprep.subr.bf16.mxu1 %v4209_v3 }
 0xc1c   : > { %3863 = vmatpush3.bf16.msra.mxu1 %v4066_v6  ;;  %v4082_v6 = vld [vmem:[%s5117_s14 + $0x4] ss:$8 sps:$4 sm:$0xff]  }
 0xc1d   : > { %3864 = vmatprep.subr.bf16.mxu1 %v4209_v3 }
 0xc20   : > { %3865 = vmatpush3.bf16.msra.mxu1 %v4067_v7  ;;  %v4085_v7 = vld [vmem:[%s5117_s14 + $0x14] ss:$8 sps:$4 sm:$0xff]  }
 0xc21   : > { %3866 = vmatprep.subr.bf16.mxu1 %v4209_v3 }
 0xc24   : > { %3867 = vmatpush3.bf16.msra.mxu1 %v4068_v8  ;;  %v4083_v8 = vld [vmem:[%s5117_s14 + $0x10] ss:$8 sps:$4 sm:$0xff]  }
 0xc25   : > { %3868 = vmatprep.subr.bf16.mxu1 %v4209_v3 }
 0xc28   : > { %3869 = vmatpush3.bf16.msra.mxu1 %v4069_v9  ;;  %v4088_v9 = vld [vmem:[%s5117_s14 + $0x24] ss:$8 sps:$4 sm:$0xff]  }
 0xc29   : > { %3894 = vmatprep.subr.bf16.mxu1 %v4209_v3 }
 0xc2b   : > { %3871 = vmatmul.mubr.bf16.vlgmr.msra.gmra.mrb[40].mxu1 %v4446_v32 }
 0xc2c   : > { %3895 = vmatpush3.bf16.msra.mxu1 %v4070_v10  ;;  %3910 = vmatprep.mubr.msk.bf16.mxu1 %vm4210_vm0, %v4209_v3  ;;  %v4086_v10 = vld [vmem:[%s5117_s14 + $0x20] ss:$8 sps:$4 sm:$0xff]  }
 0xc2d   : > { %3896 = vmatprep.subr.bf16.mxu1 %v4209_v3 }
 0xc30   : > { %3897 = vmatpush3.bf16.msra.mxu1 %v4071_v11 }
 0xc31   : > { %3898 = vmatprep.subr.bf16.mxu1 %v4209_v3 }
 0xc34   : > { %3899 = vmatpush3.bf16.msra.mxu1 %v4072_v12 }
 0xc35   : > { %3900 = vmatprep.subr.bf16.mxu1 %v4209_v3 }
 0xc38   : > { %3901 = vmatpush3.bf16.msra.mxu1 %v4073_v13 }
 0xc39   : > { %3902 = vmatprep.subr.bf16.mxu1 %v4209_v3 }
 0xc3c   : > { %3903 = vmatpush3.bf16.msra.mxu1 %v4074_v15 }
 0xc3d   : > { %3904 = vmatprep.subr.bf16.mxu1 %v4209_v3 }
 0xc40   : > { %3905 = vmatpush3.bf16.msra.mxu1 %v4075_v18  ;;  %v4091_v18 = vld [vmem:[%s5117_s14 + $0x34] ss:$8 sps:$4 sm:$0xff]  }
 0xc41   : > { %3906 = vmatprep.subr.bf16.mxu1 %v4209_v3 }
 0xc44   : > { %3907 = vmatpush3.bf16.msra.mxu1 %v4076_v19  ;;  %v4089_v19 = vld [vmem:[%s5117_s14 + $0x30] ss:$8 sps:$4 sm:$0xff]  }
 0xc45   : > { %3908 = vmatprep.subr.bf16.mxu1 %v4209_v3 }
 0xc48   : > { %3909 = vmatpush3.bf16.msra.mxu1 %v4077_v20  ;;  %v4094_v20 = vld [vmem:[%s5117_s14 + $0x44] ss:$8 sps:$4 sm:$0xff]  }
 0xc4b   : > { %3911 = vmatmul.mubr.bf16.vlgmr.msra.gmra.mrb[44].mxu1 %v4446_v32  ;;  %v3398_v32 = vld [vmem:[%s5112_s9 + $0x3] ss:$0 sm:$0xff] }
 0xcde   : > { %v2134_v21 = vpop.f32.mrb[36].mxu1 }
 0xcdf   : > { %v2140_v22 = vadd.f32 %v2134_v21, %v4811_v14  ;;  %v3852_v23 = vpop.f32.mrb[37].mxu1  ;;  %v4092_v21 = vld [vmem:[%s5117_s14 + $0x40] ss:$8 sps:$4 sm:$0xff]  }
 0xce0   : > { %v2137_v24 = vpop.f32.mrb[38].mxu1  ;;  %v4095_v23 = vld [vmem:[%s5117_s14 + $0x50] ss:$8 sps:$4 sm:$0xff]  }
 0xce1   : > { %v3853_v25 = vpop.f32.mrb[39].mxu1  ;;  %v4100_v24 = vld [vmem:[%s5117_s14 + $0x64] ss:$8 sps:$4 sm:$0xff]  }
 0xce2   : > { %v4098_v25 = vld [vmem:[%s5117_s14 + $0x60] ss:$8 sps:$4 sm:$0xff]  }
 0xcfe   : > { %v2248_v17 = vpop.f32.mrb[40].mxu1 }
 0xcff   : > { %v2249_v27 = vadd.f32 %v3346_v26, %v2248_v17  ;;  %v3872_v28 = vpop.f32.mrb[41].mxu1  ;;  %v4103_v26 = vld [vmem:[%s5117_s14 + $0x74] ss:$8 sps:$4 sm:$0xff]   ;;  %v4101_v17 = vld [vmem:[%s5117_s14 + $0x70] ss:$8 sps:$4 sm:$0xff]  }
 0xd00   : > { %v2251_v29 = vpop.f32.mrb[42].mxu1 }
 0xd01   : > { %v2480_v30 = vpack.c.bf16 %v2249_v27, %v2249_v27  ;;  %v3873_v31 = vpop.f32.mrb[43].mxu1  ;;  %v4211_v27 = vmov 0  }
 0xd03   : > { %3917 = vmatmul.mubr.msk.bf16.vlgmr.msra.gmra.mrb[36].mxu0 %vm958_vm1, %v2480_v30 }
 0xd04   : > { %3922 = vmatprep.mubr.msk.bf16.mxu0 %vm4210_vm0, %v4209_v3 }
 0xd1e   : > { %v2474_v14 = vpop.f32.mrb[44].mxu1 }
 0xd1f   : > { %v2475_v33 = vadd.f32 %v3398_v32, %v2474_v14  ;;  %v3912_v34 = vpop.f32.mrb[45].mxu1  ;;  %v3417_v32 = vld [vmem:[%s5115_s12] ss:$0 sm:$0xff] }
 0xd20   : > { %v2477_v35 = vpop.f32.mrb[46].mxu1 }
 0xd21   : > { %v2540_v36 = vpack.c.bf16 %v2475_v33, %v2475_v33  ;;  %v3913_v37 = vpop.f32.mrb[47].mxu1  ;;  %v3418_v33 = vld [vmem:[%s5116_s13] ss:$0 sm:$0xff] }
 0xd22   : > { %v4104_v37 = vld [vmem:[%s5119_s16 + $0x40] sm:$0xff]  }
 0xd23   : > { %v2545_v38 = vsel %vm1022_vm2, %v2540_v36, 0  ;;  %3592 = vmatprep.subr.bf16.mxu1 %v4104_v37 }
 0xd24   : > { %3921 = vmatpush3.bf16.msra.mxu0 %v2545_v38  ;;  %v4105_v38 = vld [vmem:[%s5119_s16] sm:$0xff]  }
 0xd25   : > { %3926 = vmatprep.subr.bf16.mxu0 %v4209_v3  ;;  %3593 = vmatpush3.bf16.msra.mxu1 %v4105_v38 }
 0xdd6   : > { %v2522_v39 = vpop.f32.mrb[36].mxu0 }
 0xdd7   : > { %v2523_v40 = vadd.f32 %v4546_v16, %v2522_v39  ;;  %v3918_v41 = vpop.f32.mrb[37].mxu0  ;;  %v4078_v16 = vld [vmem:[%s5113_s10 + $0x30] sm:$0xff]   ;;  %v4106_v39 = vld [vmem:[%s5119_s16 + $0x48] sm:$0xff]  }
 0xdd8   : > { %v2525_v42 = vpop.f32.mrb[38].mxu0  ;;  %3594 = vmatprep.subr.bf16.mxu1 %v4106_v39  ;;  %v4108_v41 = vld [vmem:[%s5119_s16 + $0x50] sm:$0xff]  }
 0xdd9   : > { %v3919_v43 = vpop.f32.mrb[39].mxu0  ;;  %v2528_v44 = vsel %vm1005_vm3, %v2523_v40, -inf  ;;  %v4109_v42 = vld [vmem:[%s5119_s16 + $0x10] sm:$0xff]  }
 0xdda   : > { %2529 = vmax.xlane.f32.xlu0 %v2528_v44  ;;  %v4110_v43 = vld [vmem:[%s5119_s16 + $0x58] sm:$0xff]  }
 0xddb   : > { %v4111_v44 = vld [vmem:[%s5119_s16 + $0x18] sm:$0xff]  }
 0xe67   : > { %v2530_v45 = vpop.xlane.xlu0 %2529 }
 0xe68   : > { %v2531_v46 = vsub.f32 %v2523_v40, %v2530_v45  ;;  %v4107_v40 = vld [vmem:[%s5119_s16 + $0x8] sm:$0xff]   ;;  %v4112_v45 = vld [vmem:[%s5119_s16 + $0x60] sm:$0xff]  }
 0xe69   : > { %3595 = vmatpush3.bf16.msra.mxu1 %v4107_v40 }
 0xe6a   : > { %v2532_v47 = vmul.f32 1.442695, %v2531_v46  ;;  %3596 = vmatprep.subr.bf16.mxu1 %v4108_v41  ;;  %v4113_v46 = vld [vmem:[%s5119_s16 + $0x20] sm:$0xff]  }
 0xe6c   : > { %4134 = vpow2.f32 %v2532_v47  ;;  %v4114_v47 = vld [vmem:[%s5119_s16 + $0x68] sm:$0xff]  }
 0xe6d   : > { %3597 = vmatpush3.bf16.msra.mxu1 %v4109_v42 }
 0xe6e   : > { %3598 = vmatprep.subr.bf16.mxu1 %v4110_v43 }
 0xe71   : > { %3599 = vmatpush3.bf16.msra.mxu1 %v4111_v44 }
 0xe72   : > { %3600 = vmatprep.subr.bf16.mxu1 %v4112_v45 }
 0xe75   : > { %3601 = vmatpush3.bf16.msra.mxu1 %v4113_v46 }
 0xe76   : > { %v4135_v48 = vpop.eup %4134  ;;  %3602 = vmatprep.subr.bf16.mxu1 %v4114_v47 }
 0xe77   : > { %v2534_v49 = vsel %vm1005_vm3, %v4135_v48, 0.0 }
 0xe78   : > { %2535 = vadd.xlane.f32.xlu1 %v2534_v49  ;;  %v4116_v49 = vld [vmem:[%s5119_s16 + $0x70] sm:$0xff]  }
 0xf05   : > { %v2536_v50 = vpop.xlane.xlu1 %2535 }
 0xf06   : > { %4136 = vrcp.f32 %v2536_v50  ;;  %v4117_v50 = vld [vmem:[%s5119_s16 + $0x30] sm:$0xff]  }
 0xf10   : > { %v4137_v51 = vpop.eup %4136 }
 0xf11   : > { %v2538_v52 = vmul.f32 %v4137_v51, %v4135_v48  ;;  %v4115_v48 = vld [vmem:[%s5119_s16 + $0x28] sm:$0xff]   ;;  %v4118_v51 = vld [vmem:[%s5119_s16 + $0x78] sm:$0xff]  }
 0xf12   : > { %3603 = vmatpush3.bf16.msra.mxu1 %v4115_v48 }
 0xf13   : > { %v2539_v53 = vpack.c.bf16 %v2538_v52, %v2538_v52  ;;  %3604 = vmatprep.subr.bf16.mxu1 %v4116_v49  ;;  %v4119_v52 = vld [vmem:[%s5119_s16 + $0x38] sm:$0xff]  }
 0xf15   : > { %3923 = vmatmul.mubr.msk.bf16.vlgmr.msra.gmra.mrb[40].mxu0 %vm1005_vm3, %v2539_v53 }
 0xf16   : > { %3927 = vmatpush3.bf16.msra.mxu0 %v4078_v16  ;;  %3930 = vmatprep.mubr.msk.bf16.mxu0 %vm4210_vm0, %v4209_v3  ;;  %v2704_v16 = vlaneseq }
 0xf17   : > { %3928 = vmatprep.subr.bf16.mxu0 %v4209_v3  ;;  %3605 = vmatpush3.bf16.msra.mxu1 %v4117_v50 }
 0xf18   : > { %3606 = vmatprep.subr.bf16.mxu1 %v4118_v51  ;;  %v2705_v53 = vshrl.u32 %v2704_v16, 7 }
 0xf1a   : > { %3929 = vmatpush3.bf16.msra.mxu0 %v4079_v54  ;;  %v2706_v54 = vsub.s32 0, %v2705_v53 }
 0xf1b   : > { %2794 = vmatprep.subr.bf16.mxu0 %v4082_v6  ;;  %3607 = vmatpush3.bf16.msra.mxu1 %v4119_v52 }
 0xfe8   : > { %v2581_v55 = vpop.f32.mrb[40].mxu0 }
 0xfe9   : > { %v2587_v56 = vpack.c.bf16 %v2581_v55, %v2581_v55  ;;  %v3924_v57 = vpop.f32.mrb[41].mxu0  ;;  %v2702_v55 = vld [vmem:[%s5118_s15] sm:$0x3] }
 0xfea   : > { %v2584_v58 = vpop.f32.mrb[42].mxu0  ;;  %v2707_v57 = vrot.slane %v2702_v55, %v2706_v54 }
 0xfeb   : > { %v3925_v59 = vpop.f32.mrb[43].mxu0  ;;  %3931 = vmatmul.mubr.msk.bf16.vlgmr.msra.gmra.mrb[44].mxu0 %vm958_vm1, %v2587_v56  ;;  %v2710_v56 = vsub.s32 1, %v2705_v53 }
 0xfec   : > { %2795 = vmatpush1.bf16.msra.mxu0 %v4080_v5  ;;  %2826 = vmatprep.mubr.bf16.mxu0 %v4211_v27 }
 0xfed   : > { %2796 = vmatprep.subr.bf16.mxu0 %v4085_v7  ;;  %v2711_v58 = vrot.slane %v2702_v55, %v2710_v56 }
 0xff0   : > { %2797 = vmatpush1.bf16.msra.mxu0 %v4083_v8 }
 0xff1   : > { %2798 = vmatprep.subr.bf16.mxu0 %v4088_v9 }
 0xff4   : > { %2799 = vmatpush1.bf16.msra.mxu0 %v4086_v10 }
 0xff5   : > { %2800 = vmatprep.subr.bf16.mxu0 %v4091_v18 }
 0xff8   : > { %2801 = vmatpush1.bf16.msra.mxu0 %v4089_v19 }
 0xff9   : > { %2802 = vmatprep.subr.bf16.mxu0 %v4094_v20 }
 0xffc   : > { %2803 = vmatpush1.bf16.msra.mxu0 %v4092_v21 }
0x10be   : > { %v2642_v60 = vpop.f32.mrb[44].mxu0 }
0x10bf   : > { %v2648_v62 = vadd.f32 %v2642_v60, %v2140_v22  ;;  %v3932_v3 = vpop.f32.mrb[45].mxu0  ;;  %v4097_v22 = vld [vmem:[%s5117_s14 + $0x54] ss:$8 sps:$4 sm:$0xff]  }
0x10c0   : > { %v2645_v63 = vpop.f32.mrb[46].mxu0  ;;  %2804 = vmatprep.subr.bf16.mxu0 %v4097_v22 }
0x10c1   : > { %v2656_v0 = vadd.f32 %v3416_v61, %v2648_v62  ;;  %v3933_v1 = vpop.f32.mrb[47].mxu0  ;;  %2805 = vmatpush1.bf16.msra.mxu0 %v4095_v23 }
0x10c2   : > { %2806 = vmatprep.subr.bf16.mxu0 %v4100_v24 }
0x10c3   : > { %v4943_v4 = vadd.f32 %v4144_v2, %v2656_v0 }
0x10c5   : > { %2660 = vadd.xlane.f32.xlu0 %v4943_v4  ;;  %2807 = vmatpush1.bf16.msra.mxu0 %v4098_v25 }
0x10c6   : > { %2808 = vmatprep.subr.bf16.mxu0 %v4103_v26  ;;  %v3435_v26 = vld [vmem:[%s5120_s17] ss:$0 sm:$0xff] }
0x10c9   : > { %2809 = vmatpush1.bf16.msra.mxu0 %v4101_v17 }
0x1152   : > { %v2661_v11 = vpop.xlane.xlu0 %2660 }
0x1153   : > { %v2662_v12 = vmul.f32 0.0078125, %v2661_v11 }
0x1155   : > { %v2663_v13 = vsub.f32 %v4943_v4, %v2662_v12 }
0x1157   : > { %v2664_v15 = vmul.f32 %v2663_v13, %v2663_v13 }
0x1159   : > { %2665 = vadd.xlane.f32.xlu1 %v2664_v15 }
0x11e6   : > { %v2666_v28 = vpop.xlane.xlu1 %2665 }
0x11e7   : > { %v2667_v29 = vmul.f32 0.0078125, %v2666_v28 }
0x11e9   : > { %v2668_v30 = vadd.f32 1e-06, %v2667_v29 }
0x11eb   : > { %4138 = vrsqrt.f32 %v2668_v30 }
0x11f5   : > { %v4139_v31 = vpop.eup %4138 }
0x11f6   : > { %v2670_v14 = vmul.f32 %v4139_v31, %v2663_v13 }
0x11f8   : > { %v2677_v34 = vmul.f32 %v3417_v32, %v2670_v14 }
0x11fa   : > { %v2684_v35 = vadd.f32 %v3418_v33, %v2677_v34 }
0x11fc   : > { %v2685_v36 = vpack.c.bf16 %v2684_v35, %v2684_v35 }
0x11fe   : > { %2827 = vmatmul.mubr.bf16.vlgmr.msra.gmra.mrb[48].mxu0 %v2685_v36 }
0x12d1   : > { %v2828_v59 = vpop.f32.mrb[48].mxu0 }
0x12d2   : > { %v2829_v60 = vadd.f32 %v2828_v59, %v2707_v57  ;;  %v2830_v61 = vpop.f32.mrb[49].mxu0 }
0x12d3   : > { %v2831_v62 = vadd.f32 %v2830_v61, %v2711_v58  ;;  %v2832_v3 = vpop.f32.mrb[50].mxu0 }
0x12d4   : > { %v2837_v63 = vmul.f32 0.044715, %v2829_v60  ;;  %v2833_v0 = vpop.f32.mrb[51].mxu0  ;;  %v2835_v15 = vmul.f32 0.5, %v2829_v60 }
0x12d5   : > { %v2838_v1 = vmul.f32 0.044715, %v2831_v62  ;;  %v2836_v19 = vmul.f32 0.5, %v2831_v62 }
0x12d6   : > { %v2839_v2 = vmul.f32 %v2837_v63, %v2829_v60 }
0x12d7   : > { %v2840_v5 = vmul.f32 %v2838_v1, %v2831_v62 }
0x12d8   : > { %v2841_v6 = vmul.f32 %v2839_v2, %v2829_v60 }
0x12d9   : > { %v2842_v7 = vmul.f32 %v2840_v5, %v2831_v62 }
0x12da   : > { %v2843_v8 = vadd.f32 %v2841_v6, %v2829_v60 }
0x12db   : > { %v2844_v9 = vadd.f32 %v2842_v7, %v2831_v62 }
0x12dc   : > { %v2845_v10 = vmul.f32 0.7978846, %v2843_v8 }
0x12dd   : > { %v2846_v11 = vmul.f32 0.7978846, %v2844_v9 }
0x12de   : > { %4140 = vtanh.f32 %v2845_v10 }
0x12df   : > { %4142 = vtanh.f32 %v2846_v11 }
0x12e8   : > { %v4141_v12 = vpop.eup %4140 }
0x12e9   : > { %v4143_v13 = vpop.eup %4142  ;;  %v2849_v18 = vadd.f32 1.0, %v4141_v12 }
0x12ea   : > { %v2850_v20 = vadd.f32 1.0, %v4143_v13 }
0x12eb   : > { %v2851_v21 = vmul.f32 %v2849_v18, %v2835_v15 }
0x12ec   : > { %v2852_v22 = vmul.f32 %v2850_v20, %v2836_v19 }
0x12ed   : > { %v2853_v24 = vpack.c.bf16 %v2851_v21, %v2851_v21 }
0x12ee   : > { %v2854_v23 = vpack.c.bf16 %v2852_v22, %v2852_v22 }
0x12f0   : > { %3022 = vmatprep.mubr.bf16.mxu1 %v2854_v23 }
0x12f1   : > { %3023 = vmatmul.mubr.bf16.vlgmr.msra.gmra.mrb[48].mxu1 %v2853_v24 }
0x13c4   : > { %v3608_v25 = vpop.f32.mrb[48].mxu1 }
0x13c5   : > { %v3609_v17 = vpop.f32.mrb[49].mxu1 }
0x13c6   : > { %v3610_v27 = vadd.f32 %v3609_v17, %v3608_v25  ;;  %v3611_v28 = vpop.f32.mrb[50].mxu1 }
0x13c7   : > { %v3612_v29 = vpop.f32.mrb[51].mxu1 }
0x13c8   : > { %v3025_v30 = vadd.f32 %v3610_v27, %v3435_v26 }
0x13ca   : > { %v3030_v31 = vadd.f32 %v3025_v30, %v4943_v4 }
0x13cc   : > { %3031 = vst [vmem:[%s577_s24] sm:$0xff] %v3030_v31 }
0x13cd   : > { %4158 = shalt.err (!%p4155_p3)
}
0x13ce   : > { %s4159_s26 = scalar_lea.hbm %s5061_s23, 128  ;;  %s4163_s27 = scalar_lea.hbm %s5121_s18, 256 }
0x13cf   : > { %p4160_p4 = scmp.ne.s32.totalorder %s5061_s23, %s4159_s26  ;;  %p4164_p9 = scmp.lt.u32.totalorder %s5061_s23, %s5121_s18 }
0x13d0   : > { %p4165_p10 = scmp.lt.u32.totalorder %s4163_s27, %s4159_s26  ;;  %p4167_p12 = scmp.lt.u32.totalorder %s4159_s26, %s5061_s23 }
0x13d1   : > { %p4161_p7 = pnand %p4160_p4, %p4346_p5 }
0x13d2   : > { %p4166_p11 = por %p4165_p10, %p4164_p9 }
0x13d3   : > { %p4162_p8 = pneg %p4161_p7 }
0x13d4   : > { %p4168_p13 = por %p4167_p12, %p4166_p11 }
0x13d6   : > { %p4169_p0 = pnand %p4168_p13, %p4162_p8 }
0x13d8   : > { %4172 = shalt.err (!%p4169_p0)
}
0x13d9   : > { %3934 = dma.vmem_to_hbm [thread:$0]  (%p4346_p5), %s5063_s1, 128, %s5061_s23, %s3033_s20  }
0x13da PF: > { %s5140_s19 = sld [smem:[#allocation5_spill]]  ;;  %p3940_p1 = scmp.ge.s32.totalorder %s4207_s30, 2 }
0x13dc   : > { %p3937_p2 = pnand %p3940_p1, %p4350_p6 }
0x13e0   : > { %s3058_s21 = sand.u32 1, %s5140_s19  }
0x13e1   : > { %s3059_s29 = scalar_lea.sflag [#allocation3], %s3058_s21 }
0x13e2   : > { %4190 = dma.done.wait (!%p3937_p2), %s3059_s29, 128  }
0x13e3   : > { %4192 = vsyncadd (!%p3937_p2), %s3059_s29, 4294967168  ;;  %s5142_s30 = sld [smem:[#allocation7_spill]]  ;;  %s5143_s26 = sld [smem:[#allocation6_spill]] }
0x13e4   : > { %s5144_s29 = sld [smem:[#allocation8_spill]]  ;;  %s5145_s27 = smov %s4199_s28 }
0x13e9   : > { %p28_p3 = scmp.ge.s32.totalorder %s5142_s30, 4   ;;  %s5146_s28 = smov %s5143_s26 }
0x13eb   :  { %30 = sbr.rel (!%p28_p3) target bundleno = 7 (0x7), region = 151 }
0x13f2   :  { %3064 = vsyncpa [#allocation3], 1 }
0x13f3   :  { %3066 = vsyncpa [#allocation3 + $0x1], 1 }

</bundles_post_ra>
